<compile_context>
chip_gen: v5e
topology: v5e:2x2
jax: 0.10.0
libtpu: 0.0.40
codegen_flags: <defaults>
</compile_context>

<pallas_src>
import jax
import jax.numpy as jnp
from jax.experimental import pallas as pl
from jax.experimental.pallas import tpu as pltpu

C1 = 16      # conv1 output channels (real count, kept unpadded -> no zero-K MXU work)
C2P = 8      # conv2 output channels padded 3 -> 8 (small, masked stores; sliced in wrapper)
LPAD = 8     # left spatial pad inside the activation scratch -> sublane-aligned interior store


def _simple_cnn_kernel(p1_ref, w1_ref, b1_ref, w2_ref, b2_ref, o_ref, hpad_ref):
    # Per grid step (one image):
    #   p1_ref  : (1, H, W, 27)          conv1 im2col patches (built in the wrapper)
    #   w1_ref  : (27, C1)               conv1 weights, im2col layout (tap-major, then cin)
    #   b1_ref  : (1, C1)                conv1 bias
    #   w2_ref  : (9, C1, C2P)           conv2 weights per tap (Cout zero-padded to C2P)
    #   b2_ref  : (1, C2P)               conv2 bias (padded)
    #   o_ref   : (1, H, W, C2P)         output (real channels first)
    #   hpad_ref: (H+2, LPAD+W+8, C1)    zero-haloed conv1 activation scratch
    _, H, W, K1 = p1_ref.shape
    WPAD = hpad_ref.shape[1]

    # ---- conv1: one K=27 im2col dot + bias + ReLU --------------------------------
    p1 = p1_ref[...].reshape(H * W, K1)
    h = jnp.dot(p1, w1_ref[...], preferred_element_type=jnp.float32) + b1_ref[...]
    h = jnp.maximum(h, 0.0)                                   # (H*W, C1)

    # ---- conv2: in-kernel 'same' padding (halo-only zeroing) + 9 accumulated dots --
    # Zero exactly the halo the shifted tap reads touch; re-done every grid step so it
    # stays correct under core-parallel execution (per-core, uninitialized scratch).
    zero_row = jnp.zeros((1, WPAD, C1), jnp.float32)
    zero_col = jnp.zeros((H, LPAD, C1), jnp.float32)
    hpad_ref[0:1, :, :] = zero_row                            # top halo row
    hpad_ref[H + 1:H + 2, :, :] = zero_row                    # bottom halo row
    hpad_ref[1:H + 1, 0:LPAD, :] = zero_col                   # left halo cols (covers col LPAD-1)
    hpad_ref[1:H + 1, LPAD + W:LPAD + W + LPAD, :] = zero_col  # right halo cols (covers col LPAD+W)
    hpad_ref[1:H + 1, LPAD:LPAD + W, :] = h.reshape(H, W, C1)  # sublane-aligned interior store

    y = b2_ref[...]                                           # (1, C2P): bias as accumulator init
    for ky in range(3):
        for kx in range(3):
            c0 = LPAD - 1 + kx
            tap = hpad_ref[ky:ky + H, c0:c0 + W, :].reshape(H * W, C1)
            y = y + jnp.dot(tap, w2_ref[3 * ky + kx],
                            preferred_element_type=jnp.float32)
    o_ref[...] = y.reshape(1, H, W, C2P).astype(o_ref.dtype)


def _prep_params(params):
    """Reshape/zero-pad weights & biases into the layouts the kernel expects."""
    w1, b1, w2, b2 = params["w1"], params["b1"], params["w2"], params["b2"]
    kh, kw, cin, c1 = w1.shape            # (3, 3, 3, 16)  HWIO
    _, _, _, c2 = w2.shape                # (3, 3, 16, 3)  HWIO
    assert c1 == C1 and c2 <= C2P
    w1p = w1.reshape(kh * kw * cin, c1).astype(jnp.float32)          # (27, C1), row = tap*3 + cin
    b1p = b1.reshape(1, c1).astype(jnp.float32)
    w2p = jnp.zeros((kh * kw, c1, C2P), jnp.float32)
    w2p = w2p.at[:, :, :c2].set(w2.reshape(kh * kw, c1, c2))
    b2p = jnp.zeros((1, C2P), jnp.float32).at[0, :c2].set(b2)
    return w1p, b1p, w2p, b2p, c2


@jax.jit
def simple_cnn_forward(x_nchw, params):
    """Matches SimpleCNN.forward: conv2(relu(conv1(x))), NCHW in / NCHW out."""
    n, cin, h, w = x_nchw.shape
    assert h % 8 == 0 and w % 8 == 0, "spatial dims must be multiples of 8"
    w1p, b1p, w2p, b2p, cout = _prep_params(params)

    # conv1 im2col patches built wrapper-side (cheap XLA pad+concat): (N, H, W, 9*cin).
    x = jnp.transpose(x_nchw, (0, 2, 3, 1))                   # NCHW -> NHWC
    xp = jnp.pad(x, ((0, 0), (1, 1), (1, 1), (0, 0)))
    patches = jnp.concatenate(
        [xp[:, ky:ky + h, kx:kx + w, :] for ky in range(3) for kx in range(3)],
        axis=-1)                                              # (N, H, W, 27)
    k1 = patches.shape[-1]
    wpad = LPAD + w + LPAD

    y = pl.pallas_call(
        _simple_cnn_kernel,
        out_shape=jax.ShapeDtypeStruct((n, h, w, C2P), jnp.float32),
        grid_spec=pltpu.PrefetchScalarGridSpec(
            num_scalar_prefetch=0,
            grid=(n,),
            in_specs=[
                pl.BlockSpec((1, h, w, k1), lambda i: (i, 0, 0, 0)),
                pl.BlockSpec((k1, C1), lambda i: (0, 0)),
                pl.BlockSpec((1, C1), lambda i: (0, 0)),
                pl.BlockSpec((9, C1, C2P), lambda i: (0, 0, 0)),
                pl.BlockSpec((1, C2P), lambda i: (0, 0)),
            ],
            out_specs=pl.BlockSpec((1, h, w, C2P), lambda i: (i, 0, 0, 0)),
            scratch_shapes=[
                pltpu.VMEM((h + 2, wpad, C1), jnp.float32),   # padded conv1 activation (~36 KB)
            ],
        ),
        compiler_params=pltpu.CompilerParams(
            dimension_semantics=("parallel",)),
    )(patches, w1p, b1p, w2p, b2p)

    # Slice the 3 real output channels; back to NCHW.
    return jnp.transpose(y[..., :cout], (0, 3, 1, 2))


def init_params(key):
    # Shapes from nn.Conv2d(3,16,3,padding=1) and nn.Conv2d(16,3,3,padding=1);
    # stored HWIO (torch OIHW weights correspond to (kh, kw, Cin, Cout) here).
    k1, k2, k3, k4 = jax.random.split(key, 4)
    return dict(
        w1=jax.random.normal(k1, (3, 3, 3, 16), jnp.float32) * 0.1,
        b1=jax.random.normal(k2, (16,), jnp.float32) * 0.1,
        w2=jax.random.normal(k3, (3, 3, 16, 3), jnp.float32) * 0.1,
        b2=jax.random.normal(k4, (3,), jnp.float32) * 0.1,
    )


def _reference_forward(x_nchw, p):
    # Pure-JAX reference (XLA conv) for the correctness check.
    dn = ("NHWC", "HWIO", "NHWC")
    x = jnp.transpose(x_nchw, (0, 2, 3, 1))
    h = jax.lax.conv_general_dilated(x, p["w1"], (1, 1), "SAME",
                                     dimension_numbers=dn) + p["b1"]
    h = jnp.maximum(h, 0.0)
    y = jax.lax.conv_general_dilated(h, p["w2"], (1, 1), "SAME",
                                     dimension_numbers=dn) + p["b2"]
    return jnp.transpose(y, (0, 3, 1, 2))


if __name__ == "__main__":
    key = jax.random.PRNGKey(0)
    k_x, k_p = jax.random.split(key)

    # Small input consistent with the module: batch=2, 3 channels, 16x16 spatial (NCHW).
    x = jax.random.normal(k_x, (2, 3, 16, 16), jnp.float32)
    params = init_params(k_p)

    out = jax.block_until_ready(simple_cnn_forward(x, params))
    ref = jax.block_until_ready(_reference_forward(x, params))

    assert out.shape == (2, 3, 16, 16), out.shape
    assert jnp.allclose(out, ref, atol=1e-4, rtol=1e-4), "mismatch vs XLA conv reference"

    print("KERNEL_OK")
</pallas_src>

<mosaic_0001>
module attributes {stable_mosaic.version = 11 : i64} {
  func.func @_simple_cnn_kernel(%arg0: i32, %arg1: memref<1x16x16x27xf32, #tpu.memory_space<vmem>>, %arg2: memref<27x16xf32, #tpu.memory_space<vmem>>, %arg3: memref<1x16xf32, #tpu.memory_space<vmem>>, %arg4: memref<9x16x8xf32, #tpu.memory_space<vmem>>, %arg5: memref<1x8xf32, #tpu.memory_space<vmem>>, %arg6: memref<1x16x16x8xf32, #tpu.memory_space<vmem>>, %arg7: memref<18x32x16xf32, #tpu.memory_space<vmem>>) attributes {dimension_semantics = [#tpu.dimension_semantics<parallel>], iteration_bounds = array<i64: 2>, scalar_prefetch = 0 : i64, scratch_operands = 1 : i64, tpu.core_type = #tpu.core_type<tc>, window_params = [{transform_indices = @transform_0, window_bounds = array<i64: 1, 16, 16, 27>}, {pipeline_mode = #tpu.pipeline_mode<synchronous>, transform_indices = @transform_1, window_bounds = array<i64: 27, 16>}, {pipeline_mode = #tpu.pipeline_mode<synchronous>, transform_indices = @transform_2, window_bounds = array<i64: 1, 16>}, {pipeline_mode = #tpu.pipeline_mode<synchronous>, transform_indices = @transform_3, window_bounds = array<i64: 9, 16, 8>}, {pipeline_mode = #tpu.pipeline_mode<synchronous>, transform_indices = @transform_4, window_bounds = array<i64: 1, 8>}, {transform_indices = @transform_5, window_bounds = array<i64: 1, 16, 16, 8>}]} {
    %c0 = arith.constant 0 : index
    %c0_0 = arith.constant 0 : index
    %c0_1 = arith.constant 0 : index
    %c0_2 = arith.constant 0 : index
    %0 = vector.load %arg1[%c0, %c0_0, %c0_1, %c0_2] : memref<1x16x16x27xf32, #tpu.memory_space<vmem>>, vector<1x16x16x27xf32>
    %1 = vector.shape_cast %0 : vector<1x16x16x27xf32> to vector<256x27xf32>
    %c0_3 = arith.constant 0 : index
    %c0_4 = arith.constant 0 : index
    %2 = vector.load %arg2[%c0_3, %c0_4] : memref<27x16xf32, #tpu.memory_space<vmem>>, vector<27x16xf32>
    %cst = arith.constant dense<0.000000e+00> : vector<256x16xf32>
    %3 = tpu.matmul %1, %2, %cst {dimension_numbers = #tpu.dot_dimension_numbers<[1], [0], [0], [1], [0, 0, 1, 1], [], []>} : vector<256x27xf32>, vector<27x16xf32>, vector<256x16xf32> -> vector<256x16xf32>
    %c0_5 = arith.constant 0 : index
    %c0_6 = arith.constant 0 : index
    %4 = vector.load %arg3[%c0_5, %c0_6] : memref<1x16xf32, #tpu.memory_space<vmem>>, vector<1x16xf32>
    %5 = vector.broadcast %4 : vector<1x16xf32> to vector<256x16xf32>
    %6 = arith.addf %3, %5 : vector<256x16xf32>
    %cst_7 = arith.constant 0.000000e+00 : f32
    %7 = vector.broadcast %cst_7 : f32 to vector<256x16xf32>
    %8 = arith.maximumf %6, %7 : vector<256x16xf32>
    %cst_8 = arith.constant 0.000000e+00 : f32
    %9 = vector.broadcast %cst_8 : f32 to vector<1x32x16xf32>
    %cst_9 = arith.constant 0.000000e+00 : f32
    %10 = vector.broadcast %cst_9 : f32 to vector<16x8x16xf32>
    %c0_10 = arith.constant 0 : index
    %c0_11 = arith.constant 0 : index
    %c0_12 = arith.constant 0 : index
    %11 = vector.load %arg7[%c0_10, %c0_11, %c0_12] : memref<18x32x16xf32, #tpu.memory_space<vmem>>, vector<1x32x16xf32>
    tpu.vector_store %arg7[%c0_10, %c0_11, %c0_12], %9 {strides = array<i32>} : memref<18x32x16xf32, #tpu.memory_space<vmem>>, vector<1x32x16xf32>,
    %c17 = arith.constant 17 : index
    %c0_13 = arith.constant 0 : index
    %c0_14 = arith.constant 0 : index
    %12 = vector.load %arg7[%c17, %c0_13, %c0_14] : memref<18x32x16xf32, #tpu.memory_space<vmem>>, vector<1x32x16xf32>
    tpu.vector_store %arg7[%c17, %c0_13, %c0_14], %9 {strides = array<i32>} : memref<18x32x16xf32, #tpu.memory_space<vmem>>, vector<1x32x16xf32>,
    %c1 = arith.constant 1 : index
    %c0_15 = arith.constant 0 : index
    %c0_16 = arith.constant 0 : index
    %13 = vector.load %arg7[%c1, %c0_15, %c0_16] : memref<18x32x16xf32, #tpu.memory_space<vmem>>, vector<16x8x16xf32>
    tpu.vector_store %arg7[%c1, %c0_15, %c0_16], %10 {strides = array<i32>} : memref<18x32x16xf32, #tpu.memory_space<vmem>>, vector<16x8x16xf32>,
    %c1_17 = arith.constant 1 : index
    %c24 = arith.constant 24 : index
    %c0_18 = arith.constant 0 : index
    %14 = vector.load %arg7[%c1_17, %c24, %c0_18] : memref<18x32x16xf32, #tpu.memory_space<vmem>>, vector<16x8x16xf32>
    tpu.vector_store %arg7[%c1_17, %c24, %c0_18], %10 {strides = array<i32>} : memref<18x32x16xf32, #tpu.memory_space<vmem>>, vector<16x8x16xf32>,
    %15 = vector.shape_cast %8 : vector<256x16xf32> to vector<16x16x16xf32>
    %c1_19 = arith.constant 1 : index
    %c8 = arith.constant 8 : index
    %c0_20 = arith.constant 0 : index
    %16 = vector.load %arg7[%c1_19, %c8, %c0_20] : memref<18x32x16xf32, #tpu.memory_space<vmem>>, vector<16x16x16xf32>
    tpu.vector_store %arg7[%c1_19, %c8, %c0_20], %15 {strides = array<i32>} : memref<18x32x16xf32, #tpu.memory_space<vmem>>, vector<16x16x16xf32>,
    %c0_21 = arith.constant 0 : index
    %c0_22 = arith.constant 0 : index
    %17 = vector.load %arg5[%c0_21, %c0_22] : memref<1x8xf32, #tpu.memory_space<vmem>>, vector<1x8xf32>
    %c0_23 = arith.constant 0 : index
    %c7 = arith.constant 7 : index
    %c0_24 = arith.constant 0 : index
    %18 = vector.load %arg7[%c0_23, %c7, %c0_24] : memref<18x32x16xf32, #tpu.memory_space<vmem>>, vector<16x16x16xf32>
    %19 = vector.shape_cast %18 : vector<16x16x16xf32> to vector<256x16xf32>
    %c0_25 = arith.constant 0 : index
    %c0_26 = arith.constant 0 : index
    %c0_27 = arith.constant 0 : index
    %20 = vector.load %arg4[%c0_25, %c0_26, %c0_27] : memref<9x16x8xf32, #tpu.memory_space<vmem>>, vector<1x16x8xf32>
    %21 = vector.shape_cast %20 : vector<1x16x8xf32> to vector<16x8xf32>
    %cst_28 = arith.constant dense<0.000000e+00> : vector<256x8xf32>
    %22 = tpu.matmul %19, %21, %cst_28 {dimension_numbers = #tpu.dot_dimension_numbers<[1], [0], [0], [1], [0, 0, 1, 1], [], []>} : vector<256x16xf32>, vector<16x8xf32>, vector<256x8xf32> -> vector<256x8xf32>
    %23 = vector.broadcast %17 : vector<1x8xf32> to vector<256x8xf32>
    %24 = arith.addf %23, %22 : vector<256x8xf32>
    %c0_29 = arith.constant 0 : index
    %c8_30 = arith.constant 8 : index
    %c0_31 = arith.constant 0 : index
    %25 = vector.load %arg7[%c0_29, %c8_30, %c0_31] : memref<18x32x16xf32, #tpu.memory_space<vmem>>, vector<16x16x16xf32>
    %26 = vector.shape_cast %25 : vector<16x16x16xf32> to vector<256x16xf32>
    %c1_32 = arith.constant 1 : index
    %c0_33 = arith.constant 0 : index
    %c0_34 = arith.constant 0 : index
    %27 = vector.load %arg4[%c1_32, %c0_33, %c0_34] : memref<9x16x8xf32, #tpu.memory_space<vmem>>, vector<1x16x8xf32>
    %28 = vector.shape_cast %27 : vector<1x16x8xf32> to vector<16x8xf32>
    %cst_35 = arith.constant dense<0.000000e+00> : vector<256x8xf32>
    %29 = tpu.matmul %26, %28, %cst_35 {dimension_numbers = #tpu.dot_dimension_numbers<[1], [0], [0], [1], [0, 0, 1, 1], [], []>} : vector<256x16xf32>, vector<16x8xf32>, vector<256x8xf32> -> vector<256x8xf32>
    %30 = arith.addf %24, %29 : vector<256x8xf32>
    %c0_36 = arith.constant 0 : index
    %c9 = arith.constant 9 : index
    %c0_37 = arith.constant 0 : index
    %31 = vector.load %arg7[%c0_36, %c9, %c0_37] : memref<18x32x16xf32, #tpu.memory_space<vmem>>, vector<16x16x16xf32>
    %32 = vector.shape_cast %31 : vector<16x16x16xf32> to vector<256x16xf32>
    %c2 = arith.constant 2 : index
    %c0_38 = arith.constant 0 : index
    %c0_39 = arith.constant 0 : index
    %33 = vector.load %arg4[%c2, %c0_38, %c0_39] : memref<9x16x8xf32, #tpu.memory_space<vmem>>, vector<1x16x8xf32>
    %34 = vector.shape_cast %33 : vector<1x16x8xf32> to vector<16x8xf32>
    %cst_40 = arith.constant dense<0.000000e+00> : vector<256x8xf32>
    %35 = tpu.matmul %32, %34, %cst_40 {dimension_numbers = #tpu.dot_dimension_numbers<[1], [0], [0], [1], [0, 0, 1, 1], [], []>} : vector<256x16xf32>, vector<16x8xf32>, vector<256x8xf32> -> vector<256x8xf32>
    %36 = arith.addf %30, %35 : vector<256x8xf32>
    %c1_41 = arith.constant 1 : index
    %c7_42 = arith.constant 7 : index
    %c0_43 = arith.constant 0 : index
    %37 = vector.load %arg7[%c1_41, %c7_42, %c0_43] : memref<18x32x16xf32, #tpu.memory_space<vmem>>, vector<16x16x16xf32>
    %38 = vector.shape_cast %37 : vector<16x16x16xf32> to vector<256x16xf32>
    %c3 = arith.constant 3 : index
    %c0_44 = arith.constant 0 : index
    %c0_45 = arith.constant 0 : index
    %39 = vector.load %arg4[%c3, %c0_44, %c0_45] : memref<9x16x8xf32, #tpu.memory_space<vmem>>, vector<1x16x8xf32>
    %40 = vector.shape_cast %39 : vector<1x16x8xf32> to vector<16x8xf32>
    %cst_46 = arith.constant dense<0.000000e+00> : vector<256x8xf32>
    %41 = tpu.matmul %38, %40, %cst_46 {dimension_numbers = #tpu.dot_dimension_numbers<[1], [0], [0], [1], [0, 0, 1, 1], [], []>} : vector<256x16xf32>, vector<16x8xf32>, vector<256x8xf32> -> vector<256x8xf32>
    %42 = arith.addf %36, %41 : vector<256x8xf32>
    %c1_47 = arith.constant 1 : index
    %c8_48 = arith.constant 8 : index
    %c0_49 = arith.constant 0 : index
    %43 = vector.load %arg7[%c1_47, %c8_48, %c0_49] : memref<18x32x16xf32, #tpu.memory_space<vmem>>, vector<16x16x16xf32>
    %44 = vector.shape_cast %43 : vector<16x16x16xf32> to vector<256x16xf32>
    %c4 = arith.constant 4 : index
    %c0_50 = arith.constant 0 : index
    %c0_51 = arith.constant 0 : index
    %45 = vector.load %arg4[%c4, %c0_50, %c0_51] : memref<9x16x8xf32, #tpu.memory_space<vmem>>, vector<1x16x8xf32>
    %46 = vector.shape_cast %45 : vector<1x16x8xf32> to vector<16x8xf32>
    %cst_52 = arith.constant dense<0.000000e+00> : vector<256x8xf32>
    %47 = tpu.matmul %44, %46, %cst_52 {dimension_numbers = #tpu.dot_dimension_numbers<[1], [0], [0], [1], [0, 0, 1, 1], [], []>} : vector<256x16xf32>, vector<16x8xf32>, vector<256x8xf32> -> vector<256x8xf32>
    %48 = arith.addf %42, %47 : vector<256x8xf32>
    %c1_53 = arith.constant 1 : index
    %c9_54 = arith.constant 9 : index
    %c0_55 = arith.constant 0 : index
    %49 = vector.load %arg7[%c1_53, %c9_54, %c0_55] : memref<18x32x16xf32, #tpu.memory_space<vmem>>, vector<16x16x16xf32>
    %50 = vector.shape_cast %49 : vector<16x16x16xf32> to vector<256x16xf32>
    %c5 = arith.constant 5 : index
    %c0_56 = arith.constant 0 : index
    %c0_57 = arith.constant 0 : index
    %51 = vector.load %arg4[%c5, %c0_56, %c0_57] : memref<9x16x8xf32, #tpu.memory_space<vmem>>, vector<1x16x8xf32>
    %52 = vector.shape_cast %51 : vector<1x16x8xf32> to vector<16x8xf32>
    %cst_58 = arith.constant dense<0.000000e+00> : vector<256x8xf32>
    %53 = tpu.matmul %50, %52, %cst_58 {dimension_numbers = #tpu.dot_dimension_numbers<[1], [0], [0], [1], [0, 0, 1, 1], [], []>} : vector<256x16xf32>, vector<16x8xf32>, vector<256x8xf32> -> vector<256x8xf32>
    %54 = arith.addf %48, %53 : vector<256x8xf32>
    %c2_59 = arith.constant 2 : index
    %c7_60 = arith.constant 7 : index
    %c0_61 = arith.constant 0 : index
    %55 = vector.load %arg7[%c2_59, %c7_60, %c0_61] : memref<18x32x16xf32, #tpu.memory_space<vmem>>, vector<16x16x16xf32>
    %56 = vector.shape_cast %55 : vector<16x16x16xf32> to vector<256x16xf32>
    %c6 = arith.constant 6 : index
    %c0_62 = arith.constant 0 : index
    %c0_63 = arith.constant 0 : index
    %57 = vector.load %arg4[%c6, %c0_62, %c0_63] : memref<9x16x8xf32, #tpu.memory_space<vmem>>, vector<1x16x8xf32>
    %58 = vector.shape_cast %57 : vector<1x16x8xf32> to vector<16x8xf32>
    %cst_64 = arith.constant dense<0.000000e+00> : vector<256x8xf32>
    %59 = tpu.matmul %56, %58, %cst_64 {dimension_numbers = #tpu.dot_dimension_numbers<[1], [0], [0], [1], [0, 0, 1, 1], [], []>} : vector<256x16xf32>, vector<16x8xf32>, vector<256x8xf32> -> vector<256x8xf32>
    %60 = arith.addf %54, %59 : vector<256x8xf32>
    %c2_65 = arith.constant 2 : index
    %c8_66 = arith.constant 8 : index
    %c0_67 = arith.constant 0 : index
    %61 = vector.load %arg7[%c2_65, %c8_66, %c0_67] : memref<18x32x16xf32, #tpu.memory_space<vmem>>, vector<16x16x16xf32>
    %62 = vector.shape_cast %61 : vector<16x16x16xf32> to vector<256x16xf32>
    %c7_68 = arith.constant 7 : index
    %c0_69 = arith.constant 0 : index
    %c0_70 = arith.constant 0 : index
    %63 = vector.load %arg4[%c7_68, %c0_69, %c0_70] : memref<9x16x8xf32, #tpu.memory_space<vmem>>, vector<1x16x8xf32>
    %64 = vector.shape_cast %63 : vector<1x16x8xf32> to vector<16x8xf32>
    %cst_71 = arith.constant dense<0.000000e+00> : vector<256x8xf32>
    %65 = tpu.matmul %62, %64, %cst_71 {dimension_numbers = #tpu.dot_dimension_numbers<[1], [0], [0], [1], [0, 0, 1, 1], [], []>} : vector<256x16xf32>, vector<16x8xf32>, vector<256x8xf32> -> vector<256x8xf32>
    %66 = arith.addf %60, %65 : vector<256x8xf32>
    %c2_72 = arith.constant 2 : index
    %c9_73 = arith.constant 9 : index
    %c0_74 = arith.constant 0 : index
    %67 = vector.load %arg7[%c2_72, %c9_73, %c0_74] : memref<18x32x16xf32, #tpu.memory_space<vmem>>, vector<16x16x16xf32>
    %68 = vector.shape_cast %67 : vector<16x16x16xf32> to vector<256x16xf32>
    %c8_75 = arith.constant 8 : index
    %c0_76 = arith.constant 0 : index
    %c0_77 = arith.constant 0 : index
    %69 = vector.load %arg4[%c8_75, %c0_76, %c0_77] : memref<9x16x8xf32, #tpu.memory_space<vmem>>, vector<1x16x8xf32>
    %70 = vector.shape_cast %69 : vector<1x16x8xf32> to vector<16x8xf32>
    %cst_78 = arith.constant dense<0.000000e+00> : vector<256x8xf32>
    %71 = tpu.matmul %68, %70, %cst_78 {dimension_numbers = #tpu.dot_dimension_numbers<[1], [0], [0], [1], [0, 0, 1, 1], [], []>} : vector<256x16xf32>, vector<16x8xf32>, vector<256x8xf32> -> vector<256x8xf32>
    %72 = arith.addf %66, %71 : vector<256x8xf32>
    %73 = vector.shape_cast %72 : vector<256x8xf32> to vector<1x16x16x8xf32>
    %c0_79 = arith.constant 0 : index
    %c0_80 = arith.constant 0 : index
    %c0_81 = arith.constant 0 : index
    %c0_82 = arith.constant 0 : index
    %74 = vector.load %arg6[%c0_79, %c0_80, %c0_81, %c0_82] : memref<1x16x16x8xf32, #tpu.memory_space<vmem>>, vector<1x16x16x8xf32>
    tpu.vector_store %arg6[%c0_79, %c0_80, %c0_81, %c0_82], %73 {strides = array<i32>} : memref<1x16x16x8xf32, #tpu.memory_space<vmem>>, vector<1x16x16x8xf32>,
    return
  }
  func.func @transform_0(%arg0: i32) -> (i32, i32, i32, i32) {
    %c0_i32 = arith.constant 0 : i32
    %c0_i32_0 = arith.constant 0 : i32
    %c0_i32_1 = arith.constant 0 : i32
    %c0_i32_2 = arith.constant 0 : i32
    return %arg0, %c0_i32, %c0_i32_0, %c0_i32_1 : i32, i32, i32, i32
  }
  func.func @transform_1(%arg0: i32) -> (i32, i32) {
    %c0_i32 = arith.constant 0 : i32
    %c0_i32_0 = arith.constant 0 : i32
    %c0_i32_1 = arith.constant 0 : i32
    return %c0_i32, %c0_i32_0 : i32, i32
  }
  func.func @transform_2(%arg0: i32) -> (i32, i32) {
    %c0_i32 = arith.constant 0 : i32
    %c0_i32_0 = arith.constant 0 : i32
    %c0_i32_1 = arith.constant 0 : i32
    return %c0_i32, %c0_i32_0 : i32, i32
  }
  func.func @transform_3(%arg0: i32) -> (i32, i32, i32) {
    %c0_i32 = arith.constant 0 : i32
    %c0_i32_0 = arith.constant 0 : i32
    %c0_i32_1 = arith.constant 0 : i32
    %c0_i32_2 = arith.constant 0 : i32
    return %c0_i32, %c0_i32_0, %c0_i32_1 : i32, i32, i32
  }
  func.func @transform_4(%arg0: i32) -> (i32, i32) {
    %c0_i32 = arith.constant 0 : i32
    %c0_i32_0 = arith.constant 0 : i32
    %c0_i32_1 = arith.constant 0 : i32
    return %c0_i32, %c0_i32_0 : i32, i32
  }
  func.func @transform_5(%arg0: i32) -> (i32, i32, i32, i32) {
    %c0_i32 = arith.constant 0 : i32
    %c0_i32_0 = arith.constant 0 : i32
    %c0_i32_1 = arith.constant 0 : i32
    %c0_i32_2 = arith.constant 0 : i32
    return %arg0, %c0_i32, %c0_i32_0, %c0_i32_1 : i32, i32, i32, i32
  }
}

</mosaic_0001>

<bundles_post_ra>
// kernel: simple_cnn_forward.1
= control target key start
LH: loop header
LB: loop body
LE: loop exit
PB: predicated region body
PF: predicated region fallthrough
CT: control target
= control target key end

     0   :  { %s3566_s18 = smov 0   ;;  %s5055_s0 = inlined_call_operand.vmem [shape: f32[2,16,16,27], index: 0, kind: input, shape index: {}]   ;;  %s5056_s1 = inlined_call_operand.vmem [shape: f32[27,16], index: 1, kind: input, shape index: {}]   ;;  %s5057_s2 = inlined_call_operand.vmem [shape: f32[1,16], index: 2, kind: input, shape index: {}]   ;;  %s5058_s3 = inlined_call_operand.vmem [shape: f32[9,16,8], index: 3, kind: input, shape index: {}]   ;;  %s5059_s4 = inlined_call_operand.vmem [shape: f32[1,8], index: 4, kind: input, shape index: {}]   ;;  %s5060_s5 = inlined_call_operand.vmem [shape: f32[2,16,16,8], index: 5, kind: output, shape index: {}]  }
   0x1 LB: > { %s3162_s19 = sadd.s32 4294967295, %s3533_s18   ;;  %p3166_p0 = scmp.ge.s32.totalorder %s3533_s18, 1  ;;  %s3533_s18 = sphi %s3566_s18, %s15_s18  }
   0x2   : > { %p187_p1 = scmp.lt.s32.totalorder %s3533_s18, 3 }
   0x4   : > { %p188_p2 = pnand %p3166_p0, %p187_p1 }
   0x6   : > { %191 = sbr.rel (%p188_p2) target bundleno = 1042 (0x412), region = 40 }
   0xb   : > { %v260_v0 = vld [vmem:[%s5056_s1 + $0x18] sm:$0x7]  ;;  %vm362_vm0 = vcmask 1042432   ;;  %v259_v1 = vld [vmem:[%s5056_s1 + $0x10] sm:$0xff]  ;;  %p215_p3 = scmp.lt.s32.totalorder %s3162_s19, 1  ;;  %v258_v2 = vld [vmem:[%s5056_s1 + $0x8] sm:$0xff] }
   0xc   : > { %3171 = vmatpush.msk.msra.mxu0 %vm362_vm0, %v260_v0  ;;  %v257_v3 = vld [vmem:[%s5056_s1] sm:$0xff]  ;;  %vm265_vm1 = vcmask 220160   ;;  %v620_v15 = vld [vmem:[%s5058_s3 + $0x8] sm:$0xff]  ;;  %vm511_vm2 = vcmask 130048   ;;  %v3535_v16 = vmov 0.0   ;;  %vm3074_vm3 = vcmask 64512  }
   0xd   : > { %s5231_s19 = smov (!%p215_p3, %s3162_s19), 1  ;;  %731 = vmatpush.msra.mxu1 %v620_v15  ;;  %3512 = vmatpush.msra.mxu3 %v620_v15  ;;  %512 = vst.msk [vmem:[#allocation2] sm:$0xff] %vm511_vm2, %v3535_v16  ;;  %v619_v18 = vld [vmem:[%s5058_s3] sm:$0xff] }
   0xe   : > { %379 = vmatpush.msra.mxu0 %v259_v1  ;;  %s3510_s28 = sshll.u32 %s5231_s19, 8  ;;  %513 = vst.msk [vmem:[#allocation2 + $0x8] sm:$0xff] %vm511_vm2, %v3535_v16  ;;  %v3679_v25 = vld [vmem:[%s5057_s2] ss:$0 sm:$0xff] }
   0xf   : > { %s3594_s6 = scalar_lea.vmem %s5055_s0, %s3510_s28  ;;  %514 = vst.msk [vmem:[#allocation2 + $0x10] sm:$0xff] %vm511_vm2, %v3535_v16  ;;  %732 = vmatpush.msra.mxu1 %v619_v18  ;;  %3513 = vmatpush.msra.mxu3 %v619_v18  ;;  %s4880_s30 = scalar_lea.vmem %s5060_s5, %s3510_s28 }
  0x10   : > { %380 = vmatpush.msra.mxu0 %v258_v2  ;;  %v225_v4 = vld [vmem:[%s3594_s6] sm:$0xff]  ;;  %v226_v5 = vld [vmem:[%s3594_s6 + $0x8] sm:$0xff]  ;;  %v227_v6 = vld [vmem:[%s3594_s6 + $0x10] sm:$0xff]  ;;  %515 = vst.msk [vmem:[#allocation2 + $0x18] sm:$0xff] %vm511_vm2, %v3535_v16 }
  0x11   : > { %v228_v7 = vld [vmem:[%s3594_s6 + $0x18] sm:$0xff]  ;;  %v229_v8 = vld [vmem:[%s3594_s6 + $0x20] sm:$0xff]  ;;  %v230_v9 = vld [vmem:[%s3594_s6 + $0x28] sm:$0xff]  ;;  %517 = vst.msk [vmem:[#allocation2 + $0x220] sm:$0xff] %vm511_vm2, %v3535_v16 }
  0x12   : > { %381 = vmatpush.msra.mxu0 %v257_v3  ;;  %v231_v10 = vld [vmem:[%s3594_s6 + $0x30] sm:$0xff]  ;;  %v232_v11 = vld [vmem:[%s3594_s6 + $0x38] sm:$0xff]  ;;  %v233_v12 = vld [vmem:[%s3594_s6 + $0x40] sm:$0xff]  ;;  %518 = vst.msk [vmem:[#allocation2 + $0x228] sm:$0xff] %vm511_vm2, %v3535_v16 }
  0x13   : > { %3172 = vmatmul.msk.f32.vlgmr.msra.gmra.mxu0 %vm265_vm1, %v225_v4  ;;  %v234_v13 = vld [vmem:[%s3594_s6 + $0x48] sm:$0xff]  ;;  %v235_v14 = vld [vmem:[%s3594_s6 + $0x50] sm:$0xff]  ;;  %v236_v17 = vld [vmem:[%s3594_s6 + $0x58] sm:$0xff]  ;;  %519 = vst.msk [vmem:[#allocation2 + $0x230] sm:$0xff] %vm511_vm2, %v3535_v16 }
  0x14   : > { %520 = vst.msk [vmem:[#allocation2 + $0x238] sm:$0xff] %vm511_vm2, %v3535_v16  ;;  %v237_v20 = vld [vmem:[%s3594_s6 + $0x60] sm:$0xff]  ;;  %v238_v22 = vld [vmem:[%s3594_s6 + $0x68] sm:$0xff]  ;;  %v239_v23 = vld [vmem:[%s3594_s6 + $0x70] sm:$0xff] }
  0x15   : > { %v587_v19 = vld [vmem:[#allocation2 + $0x7] sm:$0xff]  ;;  %522 = vst.msk [vmem:[#allocation2 + $0x20] sm:$0xff] %vm511_vm2, %v3535_v16  ;;  %v240_v24 = vld [vmem:[%s3594_s6 + $0x78] sm:$0xff]  ;;  %v243_v36 = vld [vmem:[%s3594_s6 + $0x90] sm:$0xff] }
  0x16   : > { %3204 = vmatmul.msk.f32.vlgmr.msra.gmra.mxu1 %vm511_vm2, %v587_v19  ;;  %523 = vst.msk [vmem:[#allocation2 + $0x40] sm:$0xff] %vm511_vm2, %v3535_v16  ;;  %v588_v21 = vld [vmem:[#allocation2 + $0xf] sm:$0xff]  ;;  %v241_v27 = vld [vmem:[%s3594_s6 + $0x80] sm:$0xff]  ;;  %v244_v41 = vld [vmem:[%s3594_s6 + $0x98] sm:$0xff] }
  0x17   : > { %524 = vst.msk [vmem:[#allocation2 + $0x60] sm:$0xff] %vm511_vm2, %v3535_v16  ;;  %v242_v31 = vld [vmem:[%s3594_s6 + $0x88] sm:$0xff]  ;;  %v245_v46 = vld [vmem:[%s3594_s6 + $0xa0] sm:$0xff]  ;;  %v247_v56 = vld [vmem:[%s3594_s6 + $0xb0] sm:$0xff] }
  0x18   : > { %525 = vst.msk [vmem:[#allocation2 + $0x80] sm:$0xff] %vm511_vm2, %v3535_v16  ;;  %v246_v51 = vld [vmem:[%s3594_s6 + $0xa8] sm:$0xff]  ;;  %v248_v61 = vld [vmem:[%s3594_s6 + $0xb8] sm:$0xff]  ;;  %v249_v2 = vld [vmem:[%s3594_s6 + $0xc0] sm:$0xff] }
  0x19   : > { %526 = vst.msk [vmem:[#allocation2 + $0xa0] sm:$0xff] %vm511_vm2, %v3535_v16  ;;  %v252_v19 = vld [vmem:[%s3594_s6 + $0xd8] sm:$0xff] }
  0x1a   : > { %527 = vst.msk [vmem:[#allocation2 + $0xc0] sm:$0xff] %vm511_vm2, %v3535_v16 }
  0x1b   : > { %3173 = vmatmul.msk.f32.gmra.mxu0 %vm265_vm1, %v226_v5  ;;  %528 = vst.msk [vmem:[#allocation2 + $0xe0] sm:$0xff] %vm511_vm2, %v3535_v16 }
  0x1c   : > { %529 = vst.msk [vmem:[#allocation2 + $0x100] sm:$0xff] %vm511_vm2, %v3535_v16 }
  0x1d   : > { %530 = vst.msk [vmem:[#allocation2 + $0x120] sm:$0xff] %vm511_vm2, %v3535_v16 }
  0x1e   : > { %531 = vst.msk [vmem:[#allocation2 + $0x140] sm:$0xff] %vm511_vm2, %v3535_v16  ;;  %3205 = vmatmul.msk.f32.gmra.mxu1 %vm511_vm2, %v588_v21 }
  0x1f   : > { %532 = vst.msk [vmem:[#allocation2 + $0x160] sm:$0xff] %vm511_vm2, %v3535_v16 }
  0x20   : > { %533 = vst.msk [vmem:[#allocation2 + $0x180] sm:$0xff] %vm511_vm2, %v3535_v16 }
  0x21   : > { %534 = vst.msk [vmem:[#allocation2 + $0x1a0] sm:$0xff] %vm511_vm2, %v3535_v16 }
  0x22   : > { %535 = vst.msk [vmem:[#allocation2 + $0x1c0] sm:$0xff] %vm511_vm2, %v3535_v16 }
  0x23   : > { %3174 = vmatmul.msk.f32.gmra.mxu0 %vm265_vm1, %v227_v6  ;;  %536 = vst.msk [vmem:[#allocation2 + $0x1e0] sm:$0xff] %vm511_vm2, %v3535_v16 }
  0x24   : > { %537 = vst.msk [vmem:[#allocation2 + $0x200] sm:$0xff] %vm511_vm2, %v3535_v16 }
  0x25   : > { %538 = vst.msk [vmem:[#allocation2 + $0x38] sm:$0xff] %vm511_vm2, %v3535_v16 }
  0x26   : > { %539 = vst.msk [vmem:[#allocation2 + $0x58] sm:$0xff] %vm511_vm2, %v3535_v16 }
  0x27   : > { %540 = vst.msk [vmem:[#allocation2 + $0x78] sm:$0xff] %vm511_vm2, %v3535_v16 }
  0x28   : > { %541 = vst.msk [vmem:[#allocation2 + $0x98] sm:$0xff] %vm511_vm2, %v3535_v16 }
  0x29   : > { %542 = vst.msk [vmem:[#allocation2 + $0xb8] sm:$0xff] %vm511_vm2, %v3535_v16 }
  0x2a   : > { %543 = vst.msk [vmem:[#allocation2 + $0xd8] sm:$0xff] %vm511_vm2, %v3535_v16 }
  0x2b   : > { %3175 = vmatmul.msk.f32.gmra.mxu0 %vm265_vm1, %v228_v7  ;;  %544 = vst.msk [vmem:[#allocation2 + $0xf8] sm:$0xff] %vm511_vm2, %v3535_v16  ;;  %v250_v7 = vld [vmem:[%s3594_s6 + $0xc8] sm:$0xff] }
  0x2c   : > { %545 = vst.msk [vmem:[#allocation2 + $0x118] sm:$0xff] %vm511_vm2, %v3535_v16 }
  0x2d   : > { %546 = vst.msk [vmem:[#allocation2 + $0x138] sm:$0xff] %vm511_vm2, %v3535_v16 }
  0x2e   : > { %547 = vst.msk [vmem:[#allocation2 + $0x158] sm:$0xff] %vm511_vm2, %v3535_v16 }
  0x2f   : > { %548 = vst.msk [vmem:[#allocation2 + $0x178] sm:$0xff] %vm511_vm2, %v3535_v16 }
  0x30   : > { %549 = vst.msk [vmem:[#allocation2 + $0x198] sm:$0xff] %vm511_vm2, %v3535_v16 }
  0x31   : > { %550 = vst.msk [vmem:[#allocation2 + $0x1b8] sm:$0xff] %vm511_vm2, %v3535_v16 }
  0x32   : > { %551 = vst.msk [vmem:[#allocation2 + $0x1d8] sm:$0xff] %vm511_vm2, %v3535_v16 }
  0x33   : > { %3176 = vmatmul.msk.f32.gmra.mxu0 %vm265_vm1, %v229_v8  ;;  %552 = vst.msk [vmem:[#allocation2 + $0x1f8] sm:$0xff] %vm511_vm2, %v3535_v16 }
  0x34   : > { %553 = vst.msk [vmem:[#allocation2 + $0x218] sm:$0xff] %vm511_vm2, %v3535_v16  ;;  %v3236_v16 = vld [vmem:[%s5058_s3 + $0x10] sm:$0xff] }
  0x3b   : > { %3177 = vmatmul.msk.f32.gmra.mxu0 %vm265_vm1, %v230_v9 }
  0x43   : > { %3178 = vmatmul.msk.f32.gmra.mxu0 %vm265_vm1, %v231_v10 }
  0x4b   : > { %3179 = vmatmul.msk.f32.gmra.mxu0 %vm265_vm1, %v232_v11 }
  0x53   : > { %3180 = vmatmul.msk.f32.gmra.mxu0 %vm265_vm1, %v233_v12  ;;  %v251_v12 = vld [vmem:[%s3594_s6 + $0xd0] sm:$0xff] }
  0x5b   : > { %3181 = vmatmul.msk.f32.gmra.mxu0 %vm265_vm1, %v234_v13 }
  0x63   : > { %3182 = vmatmul.msk.f32.gmra.mxu0 %vm265_vm1, %v235_v14  ;;  %v3237_v14 = vld [vmem:[%s5058_s3 + $0x18] sm:$0xff] }
  0x64   : > { %3514 = vmatpush.msra.mxu2 %v3237_v14  ;;  %1010 = vmatpush.msrb.mxu0 %v3237_v14 }
  0x66   : > { %3515 = vmatpush.msra.mxu2 %v3236_v16  ;;  %1011 = vmatpush.msrb.mxu0 %v3236_v16 }
  0x6b   : > { %3183 = vmatmul.msk.f32.gmra.mxu0 %vm265_vm1, %v236_v17 }
  0x73   : > { %3184 = vmatmul.msk.f32.gmra.mxu0 %vm265_vm1, %v237_v20 }
  0x7b   : > { %3185 = vmatmul.msk.f32.gmra.mxu0 %vm265_vm1, %v238_v22 }
  0x83   : > { %3186 = vmatmul.msk.f32.gmra.mxu0 %vm265_vm1, %v239_v23  ;;  %v3339_v23 = vld [vmem:[%s5058_s3 + $0x48] sm:$0xff] }
  0x84   : > { %1838 = vmatpush.msrb.mxu2 %v3339_v23 }
  0x8b   : > { %3187 = vmatmul.msk.f32.gmra.mxu0 %vm265_vm1, %v240_v24  ;;  %v3305_v24 = vld [vmem:[%s5058_s3 + $0x38] sm:$0xff] }
  0x8c   : > { %1562 = vmatpush.msrb.mxu1 %v3305_v24  ;;  %v3338_v24 = vld [vmem:[%s5058_s3 + $0x40] sm:$0xff] }
  0x8d   : > { %1839 = vmatpush.msrb.mxu2 %v3338_v24 }
  0x90   : > { %v383_v26 = vpop.f32.mrf.mxu0 }
  0x91   : > { %v384_v28 = vadd.f32 %v3679_v25, %v383_v26 }
  0x93   : > { %v479_v29 = vmax.f32 %v384_v28, 0.0  ;;  %3188 = vmatmul.msk.f32.gmra.mxu0 %vm265_vm1, %v241_v27  ;;  %v253_v27 = vld [vmem:[%s3594_s6 + $0xe0] sm:$0xff] }
  0x95   : > { %554 = vst.msk [vmem:[#allocation2 + $0x28] sm:$0xff] %vm511_vm2, %v479_v29 }
  0x98   : > { %v386_v30 = vpop.f32.mrf.mxu0 }
  0x99   : > { %v387_v32 = vadd.f32 %v3679_v25, %v386_v30  ;;  %v3304_v30 = vld [vmem:[%s5058_s3 + $0x30] sm:$0xff] }
  0x9a   : > { %1563 = vmatpush.msrb.mxu1 %v3304_v30 }
  0x9b   : > { %v480_v33 = vmax.f32 %v387_v32, 0.0  ;;  %3189 = vmatmul.msk.f32.gmra.mxu0 %vm265_vm1, %v242_v31  ;;  %v3271_v32 = vld [vmem:[%s5058_s3 + $0x28] sm:$0xff] }
  0x9c   : > { %v3688_v34 = vld [vmem:[#allocation2 + $0x27] sm:$0xff]  ;;  %1286 = vmatpush.msrb.mxu3 %v3271_v32 }
  0x9d   : > { %555 = vst.msk [vmem:[#allocation2 + $0x30] sm:$0xff] %vm511_vm2, %v480_v33  ;;  %3206 = vmatmul.msk.f32.gmra.mxu1 %vm511_vm2, %v3688_v34 }
  0xa0   : > { %v389_v35 = vpop.f32.mrf.mxu0 }
  0xa1   : > { %v390_v37 = vadd.f32 %v3679_v25, %v389_v35  ;;  %v254_v35 = vld [vmem:[%s3594_s6 + $0xe8] sm:$0xff] }
  0xa3   : > { %v481_v38 = vmax.f32 %v390_v37, 0.0  ;;  %3190 = vmatmul.msk.f32.gmra.mxu0 %vm265_vm1, %v243_v36 }
  0xa4   : > { %v3696_v39 = vld [vmem:[#allocation2 + $0x2f] sm:$0xff] }
  0xa5   : > { %556 = vst.msk [vmem:[#allocation2 + $0x48] sm:$0xff] %vm511_vm2, %v481_v38  ;;  %3207 = vmatmul.msk.f32.gmra.mxu1 %vm511_vm2, %v3696_v39 }
  0xa8   : > { %v392_v40 = vpop.f32.mrf.mxu0 }
  0xa9   : > { %v393_v42 = vadd.f32 %v3679_v25, %v392_v40 }
  0xab   : > { %v482_v43 = vmax.f32 %v393_v42, 0.0  ;;  %3191 = vmatmul.msk.f32.gmra.mxu0 %vm265_vm1, %v244_v41  ;;  %v255_v41 = vld [vmem:[%s3594_s6 + $0xf0] sm:$0xff] }
  0xac   : > { %v3704_v44 = vld [vmem:[#allocation2 + $0x47] sm:$0xff] }
  0xad   : > { %557 = vst.msk [vmem:[#allocation2 + $0x50] sm:$0xff] %vm511_vm2, %v482_v43  ;;  %3208 = vmatmul.msk.f32.gmra.mxu1 %vm511_vm2, %v3704_v44 }
  0xb0   : > { %v395_v45 = vpop.f32.mrf.mxu0 }
  0xb1   : > { %v396_v47 = vadd.f32 %v3679_v25, %v395_v45 }
  0xb3   : > { %v483_v48 = vmax.f32 %v396_v47, 0.0  ;;  %3192 = vmatmul.msk.f32.gmra.mxu0 %vm265_vm1, %v245_v46  ;;  %v3819_v47 = vpop.f32.mrf.mxu1 }
  0xb4   : > { %v3712_v49 = vld [vmem:[#allocation2 + $0x4f] sm:$0xff] }
  0xb5   : > { %558 = vst.msk [vmem:[#allocation2 + $0x68] sm:$0xff] %vm511_vm2, %v483_v48  ;;  %3209 = vmatmul.msk.f32.gmra.mxu1 %vm511_vm2, %v3712_v49 }
  0xb8   : > { %v398_v50 = vpop.f32.mrf.mxu0 }
  0xb9   : > { %v399_v52 = vadd.f32 %v3679_v25, %v398_v50  ;;  %v256_v50 = vld [vmem:[%s3594_s6 + $0xf8] sm:$0xff] }
  0xbb   : > { %v484_v53 = vmax.f32 %v399_v52, 0.0  ;;  %3193 = vmatmul.msk.f32.gmra.mxu0 %vm265_vm1, %v246_v51 }
  0xbc   : > { %v3720_v54 = vld [vmem:[#allocation2 + $0x67] sm:$0xff] }
  0xbd   : > { %559 = vst.msk [vmem:[#allocation2 + $0x70] sm:$0xff] %vm511_vm2, %v484_v53  ;;  %3210 = vmatmul.msk.f32.gmra.mxu1 %vm511_vm2, %v3720_v54 }
  0xc0   : > { %v401_v55 = vpop.f32.mrf.mxu0 }
  0xc1   : > { %v402_v57 = vadd.f32 %v3679_v25, %v401_v55 }
  0xc3   : > { %v485_v58 = vmax.f32 %v402_v57, 0.0  ;;  %3194 = vmatmul.msk.f32.gmra.mxu0 %vm265_vm1, %v247_v56  ;;  %v3833_v57 = vpop.f32.mrf.mxu1 }
  0xc4   : > { %v3728_v59 = vld [vmem:[#allocation2 + $0x6f] sm:$0xff] }
  0xc5   : > { %560 = vst.msk [vmem:[#allocation2 + $0x88] sm:$0xff] %vm511_vm2, %v485_v58  ;;  %3211 = vmatmul.msk.f32.gmra.mxu1 %vm511_vm2, %v3728_v59  ;;  %v865_v58 = vld [vmem:[#allocation2 + $0x8] sm:$0xff] }
  0xc8   : > { %v404_v60 = vpop.f32.mrf.mxu0 }
  0xc9   : > { %v405_v62 = vadd.f32 %v3679_v25, %v404_v60 }
  0xcb   : > { %v486_v63 = vmax.f32 %v405_v62, 0.0  ;;  %3195 = vmatmul.msk.f32.gmra.mxu0 %vm265_vm1, %v248_v61 }
  0xcc   : > { %v3736_v0 = vld [vmem:[#allocation2 + $0x87] sm:$0xff] }
  0xcd   : > { %561 = vst.msk [vmem:[#allocation2 + $0x90] sm:$0xff] %vm511_vm2, %v486_v63  ;;  %3212 = vmatmul.msk.f32.gmra.mxu1 %vm511_vm2, %v3736_v0  ;;  %v3980_v24 = vld [vmem:[#allocation2 + $0x88] sm:$0xff] }
  0xd0   : > { %v407_v1 = vpop.f32.mrf.mxu0 }
  0xd1   : > { %v408_v3 = vadd.f32 %v3679_v25, %v407_v1 }
  0xd3   : > { %v487_v4 = vmax.f32 %v408_v3, 0.0  ;;  %3196 = vmatmul.msk.f32.gmra.mxu0 %vm265_vm1, %v249_v2  ;;  %v866_v2 = vld [vmem:[#allocation2 + $0x10] sm:$0xff] }
  0xd4   : > { %v3744_v5 = vld [vmem:[#allocation2 + $0x8f] sm:$0xff] }
  0xd5   : > { %562 = vst.msk [vmem:[#allocation2 + $0xa8] sm:$0xff] %vm511_vm2, %v487_v4  ;;  %3213 = vmatmul.msk.f32.gmra.mxu1 %vm511_vm2, %v3744_v5 }
  0xd8   : > { %v410_v6 = vpop.f32.mrf.mxu0 }
  0xd9   : > { %v411_v8 = vadd.f32 %v3679_v25, %v410_v6 }
  0xdb   : > { %v488_v9 = vmax.f32 %v411_v8, 0.0  ;;  %3197 = vmatmul.msk.f32.gmra.mxu0 %vm265_vm1, %v250_v7 }
  0xdc   : > { %v3752_v10 = vld [vmem:[#allocation2 + $0xa7] sm:$0xff] }
  0xdd   : > { %563 = vst.msk [vmem:[#allocation2 + $0xb0] sm:$0xff] %vm511_vm2, %v488_v9  ;;  %3214 = vmatmul.msk.f32.gmra.mxu1 %vm511_vm2, %v3752_v10 }
  0xe0   : > { %v413_v11 = vpop.f32.mrf.mxu0 }
  0xe1   : > { %v414_v13 = vadd.f32 %v3679_v25, %v413_v11 }
  0xe3   : > { %v489_v15 = vmax.f32 %v414_v13, 0.0  ;;  %3198 = vmatmul.msk.f32.gmra.mxu0 %vm265_vm1, %v251_v12  ;;  %v3866_v12 = vld [vmem:[#allocation2 + $0x28] sm:$0xff] }
  0xe4   : > { %v3766_v17 = vld [vmem:[#allocation2 + $0xaf] sm:$0xff] }
  0xe5   : > { %564 = vst.msk [vmem:[#allocation2 + $0xc8] sm:$0xff] %vm511_vm2, %v489_v15  ;;  %3215 = vmatmul.msk.f32.gmra.mxu1 %vm511_vm2, %v3766_v17 }
  0xe8   : > { %v416_v18 = vpop.f32.mrf.mxu0 }
  0xe9   : > { %v417_v20 = vadd.f32 %v3679_v25, %v416_v18 }
  0xeb   : > { %v490_v21 = vmax.f32 %v417_v20, 0.0  ;;  %3199 = vmatmul.msk.f32.gmra.mxu0 %vm265_vm1, %v252_v19  ;;  %v3884_v19 = vld [vmem:[#allocation2 + $0x30] sm:$0xff] }
  0xec   : > { %v3774_v22 = vld [vmem:[#allocation2 + $0xc7] sm:$0xff] }
  0xed   : > { %565 = vst.msk [vmem:[#allocation2 + $0xd0] sm:$0xff] %vm511_vm2, %v490_v21  ;;  %3216 = vmatmul.msk.f32.gmra.mxu1 %vm511_vm2, %v3774_v22 }
  0xf0   : > { %v419_v26 = vpop.f32.mrf.mxu0 }
  0xf1   : > { %v420_v28 = vadd.f32 %v3679_v25, %v419_v26 }
  0xf3   : > { %v491_v29 = vmax.f32 %v420_v28, 0.0  ;;  %3200 = vmatmul.msk.f32.gmra.mxu0 %vm265_vm1, %v253_v27 }
  0xf4   : > { %v3791_v31 = vld [vmem:[#allocation2 + $0xcf] sm:$0xff] }
  0xf5   : > { %566 = vst.msk [vmem:[#allocation2 + $0xe8] sm:$0xff] %vm511_vm2, %v491_v29  ;;  %3217 = vmatmul.msk.f32.gmra.mxu1 %vm511_vm2, %v3791_v31  ;;  %v3905_v29 = vld [vmem:[#allocation2 + $0x48] sm:$0xff] }
  0xf8   : > { %v422_v33 = vpop.f32.mrf.mxu0 }
  0xf9   : > { %v423_v36 = vadd.f32 %v3679_v25, %v422_v33 }
  0xfb   : > { %v492_v37 = vmax.f32 %v423_v36, 0.0  ;;  %3201 = vmatmul.msk.f32.gmra.mxu0 %vm265_vm1, %v254_v35  ;;  %v3270_v35 = vld [vmem:[%s5058_s3 + $0x20] sm:$0xff] }
  0xfc   : > { %v3802_v38 = vld [vmem:[#allocation2 + $0xe7] sm:$0xff]  ;;  %1287 = vmatpush.msrb.mxu3 %v3270_v35 }
  0xfd   : > { %567 = vst.msk [vmem:[#allocation2 + $0xf0] sm:$0xff] %vm511_vm2, %v492_v37  ;;  %3218 = vmatmul.msk.f32.gmra.mxu1 %vm511_vm2, %v3802_v38 }
 0x100   : > { %v425_v40 = vpop.f32.mrf.mxu0 }
 0x101   : > { %v426_v42 = vadd.f32 %v3679_v25, %v425_v40 }
 0x103   : > { %v493_v43 = vmax.f32 %v426_v42, 0.0  ;;  %3202 = vmatmul.msk.f32.gmra.mxu0 %vm265_vm1, %v255_v41  ;;  %v3926_v41 = vld [vmem:[#allocation2 + $0x50] sm:$0xff] }
 0x104   : > { %v3810_v45 = vld [vmem:[#allocation2 + $0xef] sm:$0xff] }
 0x105   : > { %v3812_v46 = vld [vmem:[#allocation2 + $0xf0] sm:$0xff]  ;;  %568 = vst.msk [vmem:[#allocation2 + $0x108] sm:$0xff] %vm511_vm2, %v493_v43  ;;  %3219 = vmatmul.msk.f32.gmra.mxu1 %vm511_vm2, %v3810_v45 }
 0x106   : > { %3253 = vmatmul.msk.f32.vlgmr.msra.gmra.mxu2 %vm511_vm2, %v3812_v46 }
 0x108   : > { %v428_v48 = vpop.f32.mrf.mxu0 }
 0x109   : > { %v429_v51 = vadd.f32 %v3679_v25, %v428_v48 }
 0x10b   : > { %v494_v52 = vmax.f32 %v429_v51, 0.0  ;;  %3203 = vmatmul.msk.f32.gmra.mxu0 %vm265_vm1, %v256_v50 }
 0x10c   : > { %v3824_v53 = vld [vmem:[#allocation2 + $0x107] sm:$0xff] }
 0x10d   : > { %v3826_v55 = vld [vmem:[#allocation2 + $0x108] sm:$0xff]  ;;  %569 = vst.msk [vmem:[#allocation2 + $0x110] sm:$0xff] %vm511_vm2, %v494_v52  ;;  %3220 = vmatmul.msk.f32.gmra.mxu1 %vm511_vm2, %v3824_v53 }
 0x10e   : > { %3254 = vmatmul.msk.f32.gmra.mxu2 %vm511_vm2, %v3826_v55 }
 0x110   : > { %v431_v56 = vpop.f32.mrf.mxu0 }
 0x111   : > { %v432_v60 = vadd.f32 %v3679_v25, %v431_v56  ;;  %v3944_v56 = vld [vmem:[#allocation2 + $0x68] sm:$0xff] }
 0x113   : > { %v495_v61 = vmax.f32 %v432_v60, 0.0  ;;  %3238 = vmatmul.msk.f32.vlgmr.msrb.gmra.mxu0 %vm511_vm2, %v865_v58 }
 0x114   : > { %v3837_v62 = vld [vmem:[#allocation2 + $0x10f] sm:$0xff] }
 0x115   : > { %v3839_v63 = vld [vmem:[#allocation2 + $0x110] sm:$0xff]  ;;  %570 = vst.msk [vmem:[#allocation2 + $0x128] sm:$0xff] %vm511_vm2, %v495_v61  ;;  %3221 = vmatmul.msk.f32.vlgmr.msra.gmra.mxu3 %vm511_vm2, %v3837_v62  ;;  %3306 = vmatmul.msk.f32.vlgmr.msrb.gmra.mxu1 %vm511_vm2, %v3688_v34 }
 0x116   : > { %3255 = vmatmul.msk.f32.gmra.mxu2 %vm511_vm2, %v3839_v63 }
 0x118   : > { %v434_v1 = vpop.f32.mrf.mxu0 }
 0x119   : > { %v435_v3 = vadd.f32 %v3679_v25, %v434_v1 }
 0x11a   : > { %v3849_v4 = vpop.f32.mrf.mxu1 }
 0x11b   : > { %v496_v6 = vmax.f32 %v435_v3, 0.0  ;;  %3239 = vmatmul.msk.f32.gmra.mxu0 %vm511_vm2, %v866_v2 }
 0x11c   : > { %v3852_v7 = vld [vmem:[#allocation2 + $0x127] sm:$0xff] }
 0x11d   : > { %v3854_v8 = vld [vmem:[#allocation2 + $0x128] sm:$0xff]  ;;  %571 = vst.msk [vmem:[#allocation2 + $0x130] sm:$0xff] %vm511_vm2, %v496_v6  ;;  %3222 = vmatmul.msk.f32.gmra.mxu3 %vm511_vm2, %v3852_v7  ;;  %3307 = vmatmul.msk.f32.gmra.mxu1 %vm511_vm2, %v3696_v39  ;;  %v3962_v6 = vld [vmem:[#allocation2 + $0x70] sm:$0xff] }
 0x11e   : > { %3256 = vmatmul.msk.f32.gmra.mxu2 %vm511_vm2, %v3854_v8 }
 0x120   : > { %v437_v34 = vpop.f32.mrf.mxu0 }
 0x121   : > { %v438_v9 = vadd.f32 %v3679_v25, %v437_v34 }
 0x122   : > { %v3864_v11 = vpop.f32.mrf.mxu1 }
 0x123   : > { %v497_v13 = vmax.f32 %v438_v9, 0.0  ;;  %3240 = vmatmul.msk.f32.gmra.mxu0 %vm511_vm2, %v3866_v12 }
 0x124   : > { %v3870_v14 = vld [vmem:[#allocation2 + $0x12f] sm:$0xff] }
 0x125   : > { %v3872_v15 = vld [vmem:[#allocation2 + $0x130] sm:$0xff]  ;;  %572 = vst.msk [vmem:[#allocation2 + $0x148] sm:$0xff] %vm511_vm2, %v497_v13  ;;  %3223 = vmatmul.msk.f32.gmra.mxu3 %vm511_vm2, %v3870_v14  ;;  %3308 = vmatmul.msk.f32.gmra.mxu1 %vm511_vm2, %v3704_v44 }
 0x126   : > { %3257 = vmatmul.msk.f32.gmra.mxu2 %vm511_vm2, %v3872_v15 }
 0x128   : > { %v440_v39 = vpop.f32.mrf.mxu0 }
 0x129   : > { %v441_v16 = vadd.f32 %v3679_v25, %v440_v39 }
 0x12a   : > { %v3882_v18 = vpop.f32.mrf.mxu1 }
 0x12b   : > { %v498_v20 = vmax.f32 %v441_v16, 0.0  ;;  %3241 = vmatmul.msk.f32.gmra.mxu0 %vm511_vm2, %v3884_v19 }
 0x12c   : > { %v3888_v21 = vld [vmem:[#allocation2 + $0x147] sm:$0xff] }
 0x12d   : > { %v3890_v23 = vld [vmem:[#allocation2 + $0x148] sm:$0xff]  ;;  %573 = vst.msk [vmem:[#allocation2 + $0x150] sm:$0xff] %vm511_vm2, %v498_v20  ;;  %3224 = vmatmul.msk.f32.gmra.mxu3 %vm511_vm2, %v3888_v21  ;;  %3309 = vmatmul.msk.f32.gmra.mxu1 %vm511_vm2, %v3712_v49 }
 0x12e   : > { %3258 = vmatmul.msk.f32.gmra.mxu2 %vm511_vm2, %v3890_v23 }
 0x130   : > { %v443_v26 = vpop.f32.mrf.mxu0 }
 0x131   : > { %v444_v27 = vadd.f32 %v3679_v25, %v443_v26 }
 0x132   : > { %v3903_v28 = vpop.f32.mrf.mxu1 }
 0x133   : > { %v499_v30 = vmax.f32 %v444_v27, 0.0  ;;  %3242 = vmatmul.msk.f32.gmra.mxu0 %vm511_vm2, %v3905_v29 }
 0x134   : > { %v3909_v32 = vld [vmem:[#allocation2 + $0x14f] sm:$0xff] }
 0x135   : > { %v3911_v33 = vld [vmem:[#allocation2 + $0x150] sm:$0xff]  ;;  %574 = vst.msk [vmem:[#allocation2 + $0x168] sm:$0xff] %vm511_vm2, %v499_v30  ;;  %3225 = vmatmul.msk.f32.gmra.mxu3 %vm511_vm2, %v3909_v32  ;;  %3310 = vmatmul.msk.f32.gmra.mxu1 %vm511_vm2, %v3720_v54 }
 0x136   : > { %3259 = vmatmul.msk.f32.gmra.mxu2 %vm511_vm2, %v3911_v33 }
 0x138   : > { %v446_v36 = vpop.f32.mrf.mxu0 }
 0x139   : > { %v447_v37 = vadd.f32 %v3679_v25, %v446_v36 }
 0x13a   : > { %v3924_v40 = vpop.f32.mrf.mxu1 }
 0x13b   : > { %5100 = vst [vmem:[#allocation3_spill] sm:$0xff] %v3924_v40  ;;  %v500_v42 = vmax.f32 %v447_v37, 0.0  ;;  %3243 = vmatmul.msk.f32.gmra.mxu0 %vm511_vm2, %v3926_v41  ;;  %v1141_v40 = vld [vmem:[#allocation2 + $0x9] sm:$0xff] }
 0x13c   : > { %v3930_v43 = vld [vmem:[#allocation2 + $0x167] sm:$0xff] }
 0x13d   : > { %v3932_v48 = vld [vmem:[#allocation2 + $0x168] sm:$0xff]  ;;  %575 = vst.msk [vmem:[#allocation2 + $0x170] sm:$0xff] %vm511_vm2, %v500_v42  ;;  %3226 = vmatmul.msk.f32.gmra.mxu3 %vm511_vm2, %v3930_v43  ;;  %3311 = vmatmul.msk.f32.gmra.mxu1 %vm511_vm2, %v3728_v59  ;;  %v3998_v42 = vld [vmem:[#allocation2 + $0x90] sm:$0xff] }
 0x13e   : > { %3260 = vmatmul.msk.f32.gmra.mxu2 %vm511_vm2, %v3932_v48 }
 0x140   : > { %v449_v50 = vpop.f32.mrf.mxu0 }
 0x141   : > { %v450_v51 = vadd.f32 %v3679_v25, %v449_v50 }
 0x142   : > { %v3942_v52 = vpop.f32.mrf.mxu1 }
 0x143   : > { %5101 = vst [vmem:[#allocation4_spill] sm:$0xff] %v3942_v52  ;;  %v501_v58 = vmax.f32 %v450_v51, 0.0  ;;  %3244 = vmatmul.msk.f32.gmra.mxu0 %vm511_vm2, %v3944_v56 }
 0x144   : > { %v3948_v60 = vld [vmem:[#allocation2 + $0x16f] sm:$0xff] }
 0x145   : > { %v3950_v61 = vld [vmem:[#allocation2 + $0x170] sm:$0xff]  ;;  %576 = vst.msk [vmem:[#allocation2 + $0x188] sm:$0xff] %vm511_vm2, %v501_v58  ;;  %3227 = vmatmul.msk.f32.gmra.mxu3 %vm511_vm2, %v3948_v60  ;;  %3312 = vmatmul.msk.f32.gmra.mxu1 %vm511_vm2, %v3736_v0 }
 0x146   : > { %5102 = vst [vmem:[#allocation5_spill] sm:$0xff] %v3950_v61  ;;  %3261 = vmatmul.msk.f32.gmra.mxu2 %vm511_vm2, %v3950_v61 }
 0x148   : > { %v452_v1 = vpop.f32.mrf.mxu0 }
 0x149   : > { %v453_v2 = vadd.f32 %v3679_v25, %v452_v1 }
 0x14a   : > { %v3960_v3 = vpop.f32.mrf.mxu1 }
 0x14b   : > { %5103 = vst [vmem:[#allocation6_spill] sm:$0xff] %v3960_v3  ;;  %v502_v34 = vmax.f32 %v453_v2, 0.0  ;;  %3245 = vmatmul.msk.f32.gmra.mxu0 %vm511_vm2, %v3962_v6 }
 0x14c   : > { %v3966_v9 = vld [vmem:[#allocation2 + $0x187] sm:$0xff] }
 0x14d   : > { %v3968_v13 = vld [vmem:[#allocation2 + $0x188] sm:$0xff]  ;;  %577 = vst.msk [vmem:[#allocation2 + $0x190] sm:$0xff] %vm511_vm2, %v502_v34  ;;  %3228 = vmatmul.msk.f32.gmra.mxu3 %vm511_vm2, %v3966_v9  ;;  %3313 = vmatmul.msk.f32.gmra.mxu1 %vm511_vm2, %v3744_v5 }
 0x14e   : > { %5104 = vst [vmem:[#allocation7_spill] sm:$0xff] %v3968_v13  ;;  %3262 = vmatmul.msk.f32.gmra.mxu2 %vm511_vm2, %v3968_v13 }
 0x150   : > { %v455_v39 = vpop.f32.mrf.mxu0 }
 0x151   : > { %v456_v16 = vadd.f32 %v3679_v25, %v455_v39  ;;  %v4016_v39 = vld [vmem:[#allocation2 + $0xa8] sm:$0xff] }
 0x152   : > { %v3978_v20 = vpop.f32.mrf.mxu1 }
 0x153   : > { %5105 = vst [vmem:[#allocation8_spill] sm:$0xff] %v3978_v20  ;;  %v503_v26 = vmax.f32 %v456_v16, 0.0  ;;  %3246 = vmatmul.msk.f32.gmra.mxu0 %vm511_vm2, %v3980_v24 }
 0x154   : > { %v3984_v27 = vld [vmem:[#allocation2 + $0x18f] sm:$0xff] }
 0x155   : > { %v3986_v30 = vld [vmem:[#allocation2 + $0x190] sm:$0xff]  ;;  %578 = vst.msk [vmem:[#allocation2 + $0x1a8] sm:$0xff] %vm511_vm2, %v503_v26  ;;  %3229 = vmatmul.msk.f32.gmra.mxu3 %vm511_vm2, %v3984_v27  ;;  %3314 = vmatmul.msk.f32.gmra.mxu1 %vm511_vm2, %v3752_v10 }
 0x156   : > { %5106 = vst [vmem:[#allocation9_spill] sm:$0xff] %v3986_v30  ;;  %3263 = vmatmul.msk.f32.gmra.mxu2 %vm511_vm2, %v3986_v30 }
 0x158   : > { %v458_v35 = vpop.f32.mrf.mxu0 }
 0x159   : > { %v459_v36 = vadd.f32 %v3679_v25, %v458_v35 }
 0x15a   : > { %v3996_v37 = vpop.f32.mrf.mxu1 }
 0x15b   : > { %5107 = vst [vmem:[#allocation10_spill] sm:$0xff] %v3996_v37  ;;  %v504_v50 = vmax.f32 %v459_v36, 0.0  ;;  %3247 = vmatmul.msk.f32.gmra.mxu0 %vm511_vm2, %v3998_v42 }
 0x15c   : > { %v4002_v51 = vld [vmem:[#allocation2 + $0x1a7] sm:$0xff] }
 0x15d   : > { %v4004_v58 = vld [vmem:[#allocation2 + $0x1a8] sm:$0xff]  ;;  %579 = vst.msk [vmem:[#allocation2 + $0x1b0] sm:$0xff] %vm511_vm2, %v504_v50  ;;  %3230 = vmatmul.msk.f32.gmra.mxu3 %vm511_vm2, %v4002_v51  ;;  %3315 = vmatmul.msk.f32.gmra.mxu1 %vm511_vm2, %v3766_v17 }
 0x15e   : > { %5108 = vst [vmem:[#allocation11_spill] sm:$0xff] %v4004_v58  ;;  %3264 = vmatmul.msk.f32.gmra.mxu2 %vm511_vm2, %v4004_v58  ;;  %v3407_v50 = vld [vmem:[%s5058_s3 + $0x68] sm:$0xff] }
 0x15f   : > { %2391 = vmatpush.msra.mxu0 %v3407_v50 }
 0x160   : > { %v461_v1 = vpop.f32.mrf.mxu0 }
 0x161   : > { %v462_v2 = vadd.f32 %v3679_v25, %v461_v1 }
 0x162   : > { %v4014_v34 = vpop.f32.mrf.mxu1 }
 0x163   : > { %5109 = vst [vmem:[#allocation12_spill] sm:$0xff] %v4014_v34  ;;  %v505_v16 = vmax.f32 %v462_v2, 0.0  ;;  %3248 = vmatmul.msk.f32.gmra.mxu0 %vm511_vm2, %v4016_v39  ;;  %v3406_v34 = vld [vmem:[%s5058_s3 + $0x60] sm:$0xff] }
 0x164   : > { %v4020_v26 = vld [vmem:[#allocation2 + $0x1af] sm:$0xff]  ;;  %2392 = vmatpush.msra.mxu0 %v3406_v34 }
 0x165   : > { %v4022_v35 = vld [vmem:[#allocation2 + $0x1b0] sm:$0xff]  ;;  %580 = vst.msk [vmem:[#allocation2 + $0x1c8] sm:$0xff] %vm511_vm2, %v505_v16  ;;  %3231 = vmatmul.msk.f32.gmra.mxu3 %vm511_vm2, %v4020_v26  ;;  %3316 = vmatmul.msk.f32.gmra.mxu1 %vm511_vm2, %v3774_v22 }
 0x166   : > { %5110 = vst [vmem:[#allocation13_spill] sm:$0xff] %v4022_v35  ;;  %3265 = vmatmul.msk.f32.gmra.mxu2 %vm511_vm2, %v4022_v35  ;;  %v4037_v16 = vld [vmem:[#allocation2 + $0xb0] sm:$0xff] }
 0x168   : > { %v464_v36 = vpop.f32.mrf.mxu0 }
 0x169   : > { %v465_v1 = vadd.f32 %v3679_v25, %v464_v36  ;;  %v3373_v36 = vld [vmem:[%s5058_s3 + $0x58] sm:$0xff] }
 0x16a   : > { %v4035_v2 = vpop.f32.mrf.mxu1  ;;  %2114 = vmatpush.msra.mxu3 %v3373_v36  ;;  %v3441_v36 = vld [vmem:[%s5058_s3 + $0x78] sm:$0xff] }
 0x16b   : > { %5111 = vst [vmem:[#allocation14_spill] sm:$0xff] %v4035_v2  ;;  %v506_v37 = vmax.f32 %v465_v1, 0.0  ;;  %3249 = vmatmul.msk.f32.gmra.mxu0 %vm511_vm2, %v4037_v16  ;;  %2667 = vmatpush.msra.mxu1 %v3441_v36 }
 0x16c   : > { %v4044_v35 = vld [vmem:[#allocation2 + $0x1c7] sm:$0xff] }
 0x16d   : > { %v4046_v20 = vld [vmem:[#allocation2 + $0x1c8] sm:$0xff]  ;;  %581 = vst.msk [vmem:[#allocation2 + $0x1d0] sm:$0xff] %vm511_vm2, %v506_v37  ;;  %3232 = vmatmul.msk.f32.gmra.mxu3 %vm511_vm2, %v4044_v35  ;;  %3317 = vmatmul.msk.f32.gmra.mxu1 %vm511_vm2, %v3791_v31 }
 0x16e   : > { %5112 = vst [vmem:[#allocation15_spill] sm:$0xff] %v4046_v20  ;;  %3266 = vmatmul.msk.f32.gmra.mxu2 %vm511_vm2, %v4046_v20  ;;  %v4061_v37 = vld [vmem:[#allocation2 + $0xc8] sm:$0xff] }
 0x16f   : > { %v3475_v20 = vld [vmem:[%s5058_s3 + $0x88] sm:$0xff] }
 0x170   : > { %v467_v50 = vpop.f32.mrf.mxu0  ;;  %2943 = vmatpush.msra.mxu2 %v3475_v20 }
 0x171   : > { %v468_v1 = vadd.f32 %v3679_v25, %v467_v50 }
 0x172   : > { %v4059_v34 = vpop.f32.mrf.mxu1 }
 0x173   : > { %5113 = vst [vmem:[#allocation16_spill] sm:$0xff] %v4059_v34  ;;  %v507_v2 = vmax.f32 %v468_v1, 0.0  ;;  %3250 = vmatmul.msk.f32.gmra.mxu0 %vm511_vm2, %v4061_v37 }
 0x174   : > { %v4068_v58 = vld [vmem:[#allocation2 + $0x1cf] sm:$0xff] }
 0x175   : > { %v4070_v3 = vld [vmem:[#allocation2 + $0x1d0] sm:$0xff]  ;;  %582 = vst.msk [vmem:[#allocation2 + $0x1e8] sm:$0xff] %vm511_vm2, %v507_v2  ;;  %3233 = vmatmul.msk.f32.gmra.mxu3 %vm511_vm2, %v4068_v58  ;;  %3318 = vmatmul.msk.f32.gmra.mxu1 %vm511_vm2, %v3802_v38 }
 0x176   : > { %5114 = vst [vmem:[#allocation17_spill] sm:$0xff] %v4070_v3  ;;  %3267 = vmatmul.msk.f32.gmra.mxu2 %vm511_vm2, %v4070_v3  ;;  %v4085_v2 = vld [vmem:[#allocation2 + $0xd0] sm:$0xff] }
 0x177   : > { %5116 = vst [vmem:[#allocation19_spill] sm:$0xff] %v4085_v2 }
 0x178   : > { %v470_v50 = vpop.f32.mrf.mxu0 }
 0x179   : > { %v471_v1 = vadd.f32 %v3679_v25, %v470_v50 }
 0x17a   : > { %v4083_v20 = vpop.f32.mrf.mxu1 }
 0x17b   : > { %5115 = vst [vmem:[#allocation18_spill] sm:$0xff] %v4083_v20  ;;  %v508_v34 = vmax.f32 %v471_v1, 0.0  ;;  %3251 = vmatmul.msk.f32.gmra.mxu0 %vm511_vm2, %v4085_v2  ;;  %v4103_v20 = vld [vmem:[#allocation2 + $0xe8] sm:$0xff] }
 0x17c   : > { %v4089_v3 = vld [vmem:[#allocation2 + $0x1e7] sm:$0xff]  ;;  %5119 = vst [vmem:[#allocation22_spill] sm:$0xff] %v4103_v20 }
 0x17d   : > { %v4091_v30 = vld [vmem:[#allocation2 + $0x1e8] sm:$0xff]  ;;  %583 = vst.msk [vmem:[#allocation2 + $0x1f0] sm:$0xff] %vm511_vm2, %v508_v34  ;;  %3234 = vmatmul.msk.f32.gmra.mxu3 %vm511_vm2, %v4089_v3  ;;  %3319 = vmatmul.msk.f32.gmra.mxu1 %vm511_vm2, %v3810_v45 }
 0x17e   : > { %5117 = vst [vmem:[#allocation20_spill] sm:$0xff] %v4091_v30  ;;  %3268 = vmatmul.msk.f32.gmra.mxu2 %vm511_vm2, %v4091_v30 }
 0x180   : > { %v473_v36 = vpop.f32.mrf.mxu0 }
 0x181   : > { %v474_v50 = vadd.f32 %v3679_v25, %v473_v36 }
 0x182   : > { %v4101_v1 = vpop.f32.mrf.mxu1 }
 0x183   : > { %5118 = vst [vmem:[#allocation21_spill] sm:$0xff] %v4101_v1  ;;  %v509_v52 = vmax.f32 %v474_v50, 0.0  ;;  %3252 = vmatmul.msk.f32.gmra.mxu0 %vm511_vm2, %v4103_v20 }
 0x184   : > { %v4107_v34 = vld [vmem:[#allocation2 + $0x1ef] sm:$0xff] }
 0x185   : > { %v4109_v13 = vld [vmem:[#allocation2 + $0x1f0] sm:$0xff]  ;;  %584 = vst.msk [vmem:[#allocation2 + $0x208] sm:$0xff] %vm511_vm2, %v509_v52  ;;  %3235 = vmatmul.msk.f32.gmra.mxu3 %vm511_vm2, %v4107_v34  ;;  %3320 = vmatmul.msk.f32.gmra.mxu1 %vm511_vm2, %v3824_v53 }
 0x186   : > { %5120 = vst [vmem:[#allocation23_spill] sm:$0xff] %v4109_v13  ;;  %3269 = vmatmul.msk.f32.gmra.mxu2 %vm511_vm2, %v4109_v13 }
 0x188   : > { %v476_v36 = vpop.f32.mrf.mxu0 }
 0x189   : > { %v4118_v50 = vpop.f32.mrf.mxu2  ;;  %v477_v1 = vadd.f32 %v3679_v25, %v476_v36  ;;  %v1142_v25 = vld [vmem:[#allocation2 + $0x11] sm:$0xff] }
 0x18a   : > { %5121 = vst [vmem:[#allocation24_spill] sm:$0xff] %v4118_v50  ;;  %v4121_v30 = vpop.f32.mrf.mxu1 }
 0x18b   : > { %5122 = vst [vmem:[#allocation25_spill] sm:$0xff] %v4121_v30  ;;  %v510_v61 = vmax.f32 %v477_v1, 0.0  ;;  %3408 = vmatmul.msk.f32.vlgmr.msra.gmra.mxu0 %vm511_vm2, %v3704_v44  ;;  %v4145_v44 = vld [vmem:[%s5059_s4] ss:$0 sm:$0xff] }
 0x18d   : > { %585 = vst.msk [vmem:[#allocation2 + $0x210] sm:$0xff] %vm511_vm2, %v510_v61  ;;  %3272 = vmatmul.msk.f32.vlgmr.msrb.gmra.mxu3 %vm511_vm2, %v1141_v40  ;;  %3321 = vmatmul.msk.f32.gmra.mxu1 %vm511_vm2, %v3837_v62 }
 0x18e   : > { %3340 = vmatmul.msk.f32.vlgmr.msrb.gmra.mxu2 %vm511_vm2, %v3866_v12 }
 0x191   : > { %v4131_v52 = vpop.f32.mrf.mxu2 }
 0x192   : > { %5123 = vst [vmem:[#allocation26_spill] sm:$0xff] %v4131_v52  ;;  %v4133_v36 = vpop.f32.mrf.mxu1 }
 0x193   : > { %3409 = vmatmul.msk.f32.gmra.mxu0 %vm511_vm2, %v3712_v49 }
 0x195   : > { %3273 = vmatmul.msk.f32.gmra.mxu3 %vm511_vm2, %v1142_v25  ;;  %3322 = vmatmul.msk.f32.gmra.mxu1 %vm511_vm2, %v3852_v7 }
 0x196   : > { %3341 = vmatmul.msk.f32.gmra.mxu2 %vm511_vm2, %v3884_v19  ;;  %v4154_v19 = vld [vmem:[#allocation2 + $0x29] sm:$0xff] }
 0x197   : > { %5125 = vst [vmem:[#allocation28_spill] sm:$0xff] %v4154_v19 }
 0x198   : > { %v785_v12 = vpop.f32.mrf.mxu3 }
 0x199   : > { %v850_v40 = vadd.f32 %v4145_v44, %v785_v12  ;;  %v1064_v61 = vpop.f32.mrf.mxu2 }
 0x19a   : > { %v4150_v49 = vpop.f32.mrf.mxu1 }
 0x19b   : > { %v4148_v1 = vadd.f32 %v1064_v61, %v850_v40  ;;  %3410 = vmatmul.msk.f32.gmra.mxu0 %vm511_vm2, %v3720_v54  ;;  %v4169_v54 = vld [vmem:[#allocation2 + $0x31] sm:$0xff] }
 0x19c   : > { %5127 = vst [vmem:[#allocation30_spill] sm:$0xff] %v4169_v54 }
 0x19d   : > { %5124 = vst [vmem:[#allocation27_spill] sm:$0xff] %v4148_v1  ;;  %3274 = vmatmul.msk.f32.gmra.mxu3 %vm511_vm2, %v4154_v19  ;;  %3323 = vmatmul.msk.f32.gmra.mxu1 %vm511_vm2, %v3870_v14  ;;  %v4201_v19 = vld [vmem:[#allocation2 + $0x51] sm:$0xff] }
 0x19e   : > { %3342 = vmatmul.msk.f32.gmra.mxu2 %vm511_vm2, %v3905_v29  ;;  %5131 = vst [vmem:[#allocation34_spill] sm:$0xff] %v4201_v19 }
 0x1a0   : > { %v788_v25 = vpop.f32.mrf.mxu3 }
 0x1a1   : > { %v851_v12 = vadd.f32 %v4145_v44, %v788_v25  ;;  %v1067_v40 = vpop.f32.mrf.mxu2 }
 0x1a2   : > { %v4165_v1 = vpop.f32.mrf.mxu1 }
 0x1a3   : > { %v4163_v61 = vadd.f32 %v1067_v40, %v851_v12  ;;  %3411 = vmatmul.msk.f32.gmra.mxu0 %vm511_vm2, %v3728_v59 }
 0x1a5   : > { %5126 = vst [vmem:[#allocation29_spill] sm:$0xff] %v4163_v61  ;;  %3275 = vmatmul.msk.f32.gmra.mxu3 %vm511_vm2, %v4169_v54  ;;  %3324 = vmatmul.msk.f32.gmra.mxu1 %vm511_vm2, %v3888_v21  ;;  %v4178_v61 = vpop.f32.mrf.mxu0  ;;  %v4186_v54 = vld [vmem:[#allocation2 + $0x49] sm:$0xff] }
 0x1a6   : > { %3343 = vmatmul.msk.f32.gmra.mxu2 %vm511_vm2, %v3926_v41  ;;  %5129 = vst [vmem:[#allocation32_spill] sm:$0xff] %v4186_v54 }
 0x1a8   : > { %v791_v25 = vpop.f32.mrf.mxu3 }
 0x1a9   : > { %v852_v12 = vadd.f32 %v4145_v44, %v791_v25  ;;  %v1070_v40 = vpop.f32.mrf.mxu2 }
 0x1aa   : > { %v4182_v59 = vpop.f32.mrf.mxu1 }
 0x1ab   : > { %v4180_v52 = vadd.f32 %v1070_v40, %v852_v12  ;;  %3412 = vmatmul.msk.f32.gmra.mxu0 %vm511_vm2, %v3736_v0 }
 0x1ad   : > { %5128 = vst [vmem:[#allocation31_spill] sm:$0xff] %v4180_v52  ;;  %3276 = vmatmul.msk.f32.gmra.mxu3 %vm511_vm2, %v4186_v54  ;;  %3325 = vmatmul.msk.f32.gmra.mxu1 %vm511_vm2, %v3909_v32  ;;  %v4203_v54 = vpop.f32.mrf.mxu0 }
 0x1ae   : > { %3344 = vmatmul.msk.f32.gmra.mxu2 %vm511_vm2, %v3944_v56 }
 0x1b0   : > { %v794_v25 = vpop.f32.mrf.mxu3 }
 0x1b1   : > { %v853_v12 = vadd.f32 %v4145_v44, %v794_v25  ;;  %v1073_v40 = vpop.f32.mrf.mxu2 }
 0x1b2   : > { %v4199_v0 = vpop.f32.mrf.mxu1 }
 0x1b3   : > { %v4195_v52 = vadd.f32 %v1073_v40, %v853_v12  ;;  %3413 = vmatmul.msk.f32.gmra.mxu0 %vm511_vm2, %v3744_v5 }
 0x1b5   : > { %5130 = vst [vmem:[#allocation33_spill] sm:$0xff] %v4195_v52  ;;  %3277 = vmatmul.msk.f32.gmra.mxu3 %vm511_vm2, %v4201_v19  ;;  %3326 = vmatmul.msk.f32.gmra.mxu1 %vm511_vm2, %v3930_v43  ;;  %v4216_v52 = vld [vmem:[#allocation2 + $0x69] sm:$0xff] }
 0x1b6   : > { %3345 = vmatmul.msk.f32.gmra.mxu2 %vm511_vm2, %v3962_v6  ;;  %5133 = vst [vmem:[#allocation36_spill] sm:$0xff] %v4216_v52 }
 0x1b8   : > { %v797_v25 = vpop.f32.mrf.mxu3 }
 0x1b9   : > { %v854_v12 = vadd.f32 %v4145_v44, %v797_v25  ;;  %v1076_v40 = vpop.f32.mrf.mxu2  ;;  %v4226_v25 = vpop.f32.mrf.mxu0 }
 0x1ba   : > { %v4222_v19 = vpop.f32.mrf.mxu1 }
 0x1bb   : > { %v4212_v5 = vadd.f32 %v1076_v40, %v854_v12  ;;  %3414 = vmatmul.msk.f32.gmra.mxu0 %vm511_vm2, %v3752_v10 }
 0x1bd   : > { %5132 = vst [vmem:[#allocation35_spill] sm:$0xff] %v4212_v5  ;;  %3278 = vmatmul.msk.f32.gmra.mxu3 %vm511_vm2, %v4216_v52  ;;  %3327 = vmatmul.msk.f32.gmra.mxu1 %vm511_vm2, %v3948_v60  ;;  %v4233_v52 = vld [vmem:[#allocation2 + $0x71] sm:$0xff] }
 0x1be   : > { %3346 = vmatmul.msk.f32.gmra.mxu2 %vm511_vm2, %v3980_v24  ;;  %5135 = vst [vmem:[#allocation38_spill] sm:$0xff] %v4233_v52 }
 0x1c0   : > { %v800_v12 = vpop.f32.mrf.mxu3 }
 0x1c1   : > { %v855_v40 = vadd.f32 %v4145_v44, %v800_v12  ;;  %v1079_v5 = vpop.f32.mrf.mxu2  ;;  %v4243_v50 = vpop.f32.mrf.mxu0 }
 0x1c2   : > { %v4241_v30 = vpop.f32.mrf.mxu1 }
 0x1c3   : > { %v4229_v10 = vadd.f32 %v1079_v5, %v855_v40  ;;  %3415 = vmatmul.msk.f32.gmra.mxu0 %vm511_vm2, %v3766_v17 }
 0x1c5   : > { %5134 = vst [vmem:[#allocation37_spill] sm:$0xff] %v4229_v10  ;;  %3279 = vmatmul.msk.f32.gmra.mxu3 %vm511_vm2, %v4233_v52  ;;  %3328 = vmatmul.msk.f32.gmra.mxu1 %vm511_vm2, %v3966_v9  ;;  %v4250_v10 = vld [vmem:[#allocation2 + $0x89] sm:$0xff] }
 0x1c6   : > { %3347 = vmatmul.msk.f32.gmra.mxu2 %vm511_vm2, %v3998_v42  ;;  %5137 = vst [vmem:[#allocation40_spill] sm:$0xff] %v4250_v10 }
 0x1c8   : > { %v803_v12 = vpop.f32.mrf.mxu3 }
 0x1c9   : > { %v856_v5 = vadd.f32 %v4145_v44, %v803_v12  ;;  %v1082_v40 = vpop.f32.mrf.mxu2 }
 0x1cb   : > { %v4246_v17 = vadd.f32 %v1082_v40, %v856_v5  ;;  %3416 = vmatmul.msk.f32.gmra.mxu0 %vm511_vm2, %v3774_v22  ;;  %v4259_v5 = vpop.f32.mrf.mxu1  ;;  %v4261_v40 = vpop.f32.mrf.mxu0 }
 0x1cc   : > { %5138 = vst [vmem:[#allocation41_spill] sm:$0xff] %v4259_v5 }
 0x1cd   : > { %5136 = vst [vmem:[#allocation39_spill] sm:$0xff] %v4246_v17  ;;  %3280 = vmatmul.msk.f32.gmra.mxu3 %vm511_vm2, %v4250_v10  ;;  %3329 = vmatmul.msk.f32.gmra.mxu1 %vm511_vm2, %v3984_v27  ;;  %v4267_v17 = vld [vmem:[#allocation2 + $0x91] sm:$0xff] }
 0x1ce   : > { %3348 = vmatmul.msk.f32.gmra.mxu2 %vm511_vm2, %v4016_v39  ;;  %5140 = vst [vmem:[#allocation43_spill] sm:$0xff] %v4267_v17 }
 0x1d0   : > { %v806_v52 = vpop.f32.mrf.mxu3 }
 0x1d1   : > { %v857_v12 = vadd.f32 %v4145_v44, %v806_v52  ;;  %v1085_v13 = vpop.f32.mrf.mxu2 }
 0x1d3   : > { %v4263_v22 = vadd.f32 %v1085_v13, %v857_v12  ;;  %3417 = vmatmul.msk.f32.gmra.mxu0 %vm511_vm2, %v3791_v31  ;;  %v4280_v31 = vpop.f32.mrf.mxu1  ;;  %v4282_v12 = vld [vmem:[#allocation2 + $0xa9] sm:$0xff] }
 0x1d4   : > { %5142 = vst [vmem:[#allocation45_spill] sm:$0xff] %v4282_v12 }
 0x1d5   : > { %5139 = vst [vmem:[#allocation42_spill] sm:$0xff] %v4263_v22  ;;  %3281 = vmatmul.msk.f32.gmra.mxu3 %vm511_vm2, %v4267_v17  ;;  %3330 = vmatmul.msk.f32.gmra.mxu1 %vm511_vm2, %v4002_v51  ;;  %v4284_v22 = vpop.f32.mrf.mxu0 }
 0x1d6   : > { %3349 = vmatmul.msk.f32.gmra.mxu2 %vm511_vm2, %v4037_v16 }
 0x1d8   : > { %v809_v52 = vpop.f32.mrf.mxu3 }
 0x1d9   : > { %v858_v10 = vadd.f32 %v4145_v44, %v809_v52  ;;  %v1088_v5 = vpop.f32.mrf.mxu2 }
 0x1db   : > { %v4276_v13 = vadd.f32 %v1088_v5, %v858_v10  ;;  %3418 = vmatmul.msk.f32.gmra.mxu0 %vm511_vm2, %v3802_v38 }
 0x1dd   : > { %5141 = vst [vmem:[#allocation44_spill] sm:$0xff] %v4276_v13  ;;  %3282 = vmatmul.msk.f32.gmra.mxu3 %vm511_vm2, %v4282_v12  ;;  %3331 = vmatmul.msk.f32.gmra.mxu1 %vm511_vm2, %v4020_v26  ;;  %v4297_v13 = vld [vmem:[#allocation2 + $0xb1] sm:$0xff]  ;;  %v4303_v12 = vpop.f32.mrf.mxu1 }
 0x1de   : > { %3350 = vmatmul.msk.f32.gmra.mxu2 %vm511_vm2, %v4061_v37  ;;  %5144 = vst [vmem:[#allocation47_spill] sm:$0xff] %v4297_v13 }
 0x1e0   : > { %v812_v10 = vpop.f32.mrf.mxu3 }
 0x1e1   : > { %v859_v5 = vadd.f32 %v4145_v44, %v812_v10  ;;  %v1091_v52 = vpop.f32.mrf.mxu2  ;;  %v4307_v10 = vpop.f32.mrf.mxu0 }
 0x1e3   : > { %v4293_v38 = vadd.f32 %v1091_v52, %v859_v5  ;;  %3419 = vmatmul.msk.f32.gmra.mxu0 %vm511_vm2, %v3810_v45 }
 0x1e5   : > { %5143 = vst [vmem:[#allocation46_spill] sm:$0xff] %v4293_v38  ;;  %3283 = vmatmul.msk.f32.gmra.mxu3 %vm511_vm2, %v4297_v13  ;;  %3332 = vmatmul.msk.f32.gmra.mxu1 %vm511_vm2, %v4044_v35  ;;  %v4314_v13 = vld [vmem:[#allocation2 + $0xc9] sm:$0xff] }
 0x1e6   : > { %3351 = vmatmul.msk.f32.gmra.mxu2 %vm511_vm2, %v4085_v2  ;;  %5146 = vst [vmem:[#allocation49_spill] sm:$0xff] %v4314_v13  ;;  %v3440_v2 = vld [vmem:[%s5058_s3 + $0x70] sm:$0xff] }
 0x1e7   : > { %2668 = vmatpush.msra.mxu1 %v3440_v2 }
 0x1e8   : > { %v815_v5 = vpop.f32.mrf.mxu3 }
 0x1e9   : > { %v860_v52 = vadd.f32 %v4145_v44, %v815_v5  ;;  %v1094_v38 = vpop.f32.mrf.mxu2  ;;  %v3372_v5 = vld [vmem:[%s5058_s3 + $0x50] sm:$0xff] }
 0x1ea   : > { %2115 = vmatpush.msra.mxu3 %v3372_v5 }
 0x1eb   : > { %v4310_v45 = vadd.f32 %v1094_v38, %v860_v52  ;;  %3420 = vmatmul.msk.f32.gmra.mxu0 %vm511_vm2, %v3824_v53  ;;  %v4325_v38 = vpop.f32.mrf.mxu1  ;;  %v4327_v53 = vpop.f32.mrf.mxu0 }
 0x1ed   : > { %5145 = vst [vmem:[#allocation48_spill] sm:$0xff] %v4310_v45  ;;  %3284 = vmatmul.msk.f32.gmra.mxu3 %vm511_vm2, %v4314_v13  ;;  %3333 = vmatmul.msk.f32.gmra.mxu1 %vm511_vm2, %v4068_v58 }
 0x1ee   : > { %3352 = vmatmul.msk.f32.gmra.mxu2 %vm511_vm2, %v4103_v20  ;;  %v4334_v20 = vld [vmem:[#allocation2 + $0xd1] sm:$0xff] }
 0x1ef   : > { %5148 = vst [vmem:[#allocation51_spill] sm:$0xff] %v4334_v20 }
 0x1f0   : > { %v818_v52 = vpop.f32.mrf.mxu3 }
 0x1f1   : > { %v861_v45 = vadd.f32 %v4145_v44, %v818_v52  ;;  %v1097_v17 = vpop.f32.mrf.mxu2 }
 0x1f3   : > { %v4330_v13 = vadd.f32 %v1097_v17, %v861_v45  ;;  %3421 = vmatmul.msk.f32.gmra.mxu0 %vm511_vm2, %v3837_v62  ;;  %v3474_v17 = vld [vmem:[%s5058_s3 + $0x80] sm:$0xff]  ;;  %v4349_v52 = vpop.f32.mrf.mxu1 }
 0x1f4   : > { %2944 = vmatpush.msra.mxu2 %v3474_v17 }
 0x1f5   : > { %5147 = vst [vmem:[#allocation50_spill] sm:$0xff] %v4330_v13  ;;  %3285 = vmatmul.msk.f32.gmra.mxu3 %vm511_vm2, %v4334_v20  ;;  %3334 = vmatmul.msk.f32.gmra.mxu1 %vm511_vm2, %v4089_v3  ;;  %v4351_v13 = vpop.f32.mrf.mxu0 }
 0x1f6   : > { %3353 = vmatmul.msk.f32.gmra.mxu2 %vm511_vm2, %v3812_v46  ;;  %v4357_v46 = vld [vmem:[#allocation2 + $0xe9] sm:$0xff] }
 0x1f7   : > { %5150 = vst [vmem:[#allocation53_spill] sm:$0xff] %v4357_v46 }
 0x1f8   : > { %v821_v62 = vpop.f32.mrf.mxu3 }
 0x1f9   : > { %v862_v45 = vadd.f32 %v4145_v44, %v821_v62  ;;  %v1100_v5 = vpop.f32.mrf.mxu2 }
 0x1fb   : > { %v4353_v20 = vadd.f32 %v1100_v5, %v862_v45  ;;  %3422 = vmatmul.msk.f32.gmra.mxu0 %vm511_vm2, %v3852_v7  ;;  %v4370_v7 = vld [vmem:[#allocation2 + $0x207] sm:$0xff]  ;;  %v4372_v5 = vpop.f32.mrf.mxu1 }
 0x1fd   : > { %5149 = vst [vmem:[#allocation52_spill] sm:$0xff] %v4353_v20  ;;  %3286 = vmatmul.msk.f32.gmra.mxu3 %vm511_vm2, %v4357_v46  ;;  %3335 = vmatmul.msk.f32.gmra.mxu1 %vm511_vm2, %v4107_v34  ;;  %v4374_v20 = vld [vmem:[#allocation2 + $0xf1] sm:$0xff]  ;;  %v4376_v46 = vpop.f32.mrf.mxu0 }
 0x1fe   : > { %3354 = vmatmul.msk.f32.gmra.mxu2 %vm511_vm2, %v3826_v55  ;;  %5152 = vst [vmem:[#allocation55_spill] sm:$0xff] %v4374_v20 }
 0x200   : > { %v824_v2 = vpop.f32.mrf.mxu3 }
 0x201   : > { %v863_v17 = vadd.f32 %v4145_v44, %v824_v2  ;;  %v1103_v62 = vpop.f32.mrf.mxu2 }
 0x203   : > { %v4366_v45 = vadd.f32 %v1103_v62, %v863_v17  ;;  %3423 = vmatmul.msk.f32.gmra.mxu0 %vm511_vm2, %v3870_v14  ;;  %v4389_v62 = vld [vmem:[#allocation2 + $0x20f] sm:$0xff] }
 0x205   : > { %5151 = vst [vmem:[#allocation54_spill] sm:$0xff] %v4366_v45  ;;  %3287 = vmatmul.msk.f32.gmra.mxu3 %vm511_vm2, %v4374_v20  ;;  %3336 = vmatmul.msk.f32.gmra.mxu1 %vm511_vm2, %v4370_v7  ;;  %v4391_v45 = vld [vmem:[#allocation2 + $0x109] sm:$0xff]  ;;  %v833_v20 = vadd.f32 %v4145_v44, %v3819_v47 }
 0x206   : > { %3355 = vmatmul.msk.f32.gmra.mxu2 %vm511_vm2, %v3839_v63  ;;  %5154 = vst [vmem:[#allocation57_spill] sm:$0xff] %v4391_v45  ;;  %v4399_v63 = vpop.f32.mrf.mxu1 }
 0x207   : > { %5155 = vst [vmem:[#allocation58_spill] sm:$0xff] %v4399_v63 }
 0x208   : > { %v827_v55 = vpop.f32.mrf.mxu3 }
 0x209   : > { %v864_v14 = vadd.f32 %v4145_v44, %v827_v55  ;;  %v1106_v2 = vpop.f32.mrf.mxu2  ;;  %v4404_v55 = vpop.f32.mrf.mxu0 }
 0x20b   : > { %v4385_v17 = vadd.f32 %v1106_v2, %v864_v14  ;;  %3424 = vmatmul.msk.f32.gmra.mxu0 %vm511_vm2, %v3888_v21  ;;  %v1109_v21 = vadd.f32 %v4178_v61, %v833_v20 }
 0x20d   : > { %5153 = vst [vmem:[#allocation56_spill] sm:$0xff] %v4385_v17  ;;  %3288 = vmatmul.msk.f32.gmra.mxu3 %vm511_vm2, %v4391_v45  ;;  %3337 = vmatmul.msk.f32.gmra.mxu1 %vm511_vm2, %v4389_v62  ;;  %v4409_v45 = vld [vmem:[#allocation2 + $0x111] sm:$0xff] }
 0x20e   : > { %3356 = vmatmul.msk.f32.gmra.mxu2 %vm511_vm2, %v3854_v8  ;;  %v834_v8 = vadd.f32 %v4145_v44, %v3833_v57 }
 0x210   : > { %v1289_v14 = vpop.f32.mrf.mxu3  ;;  %v1110_v20 = vadd.f32 %v4203_v54, %v834_v8 }
 0x211   : > { %v1385_v2 = vadd.f32 %v1289_v14, %v1109_v21  ;;  %v1841_v17 = vpop.f32.mrf.mxu2  ;;  %v4424_v61 = vpop.f32.mrf.mxu0  ;;  %v4429_v14 = vld [vmem:[#allocation2 + $0x129] sm:$0xff] }
 0x213   : > { %v1661_v47 = vadd.f32 %v4133_v36, %v1385_v2  ;;  %3425 = vmatmul.msk.f32.gmra.mxu0 %vm511_vm2, %v3909_v32  ;;  %v4422_v36 = vpop.f32.mrf.mxu1 }
 0x215   : > { %v4413_v63 = vadd.f32 %v1841_v17, %v1661_v47  ;;  %3289 = vmatmul.msk.f32.gmra.mxu3 %vm511_vm2, %v4409_v45  ;;  %3442 = vmatmul.msk.f32.vlgmr.msra.gmra.mxu1 %vm511_vm2, %v3905_v29 }
 0x216   : > { %3357 = vmatmul.msk.f32.gmra.mxu2 %vm511_vm2, %v3872_v15  ;;  %v835_v15 = vadd.f32 %v4145_v44, %v3849_v4 }
 0x218   : > { %v1292_v32 = vpop.f32.mrf.mxu3 }
 0x219   : > { %v1386_v21 = vadd.f32 %v1292_v32, %v1110_v20  ;;  %v1844_v57 = vpop.f32.mrf.mxu2  ;;  %v4444_v8 = vpop.f32.mrf.mxu0  ;;  %v4449_v20 = vld [vmem:[#allocation2 + $0x131] sm:$0xff] }
 0x21b   : > { %v1662_v17 = vadd.f32 %v4150_v49, %v1386_v21  ;;  %3426 = vmatmul.msk.f32.gmra.mxu0 %vm511_vm2, %v3930_v43  ;;  %v1111_v49 = vadd.f32 %v4226_v25, %v835_v15  ;;  %v4442_v47 = vpop.f32.mrf.mxu1 }
 0x21d   : > { %v4433_v29 = vadd.f32 %v1844_v57, %v1662_v17  ;;  %3290 = vmatmul.msk.f32.gmra.mxu3 %vm511_vm2, %v4429_v14  ;;  %3443 = vmatmul.msk.f32.gmra.mxu1 %vm511_vm2, %v3926_v41  ;;  %v4467_v57 = vld [vmem:[#allocation2 + $0x149] sm:$0xff] }
 0x21e   : > { %3358 = vmatmul.msk.f32.gmra.mxu2 %vm511_vm2, %v3890_v23  ;;  %v836_v23 = vadd.f32 %v4145_v44, %v3864_v11 }
 0x220   : > { %v1295_v54 = vpop.f32.mrf.mxu3 }
 0x221   : > { %v1387_v43 = vadd.f32 %v1295_v54, %v1111_v49  ;;  %v1847_v2 = vpop.f32.mrf.mxu2  ;;  %v4471_v17 = vpop.f32.mrf.mxu0  ;;  %v4485_v49 = vld [vmem:[#allocation2 + $0x151] sm:$0xff]  ;;  %v838_v54 = vadd.f32 %v4145_v44, %v3903_v28 }
 0x223   : > { %v1663_v4 = vadd.f32 %v4165_v1, %v1387_v43  ;;  %3427 = vmatmul.msk.f32.gmra.mxu0 %vm511_vm2, %v3948_v60  ;;  %v1112_v1 = vadd.f32 %v4243_v50, %v836_v23  ;;  %v4465_v11 = vpop.f32.mrf.mxu1  ;;  %v4505_v23 = vld [vmem:[#allocation2 + $0x169] sm:$0xff] }
 0x225   : > { %v4453_v41 = vadd.f32 %v1847_v2, %v1663_v4  ;;  %3291 = vmatmul.msk.f32.gmra.mxu3 %vm511_vm2, %v4449_v20  ;;  %3444 = vmatmul.msk.f32.gmra.mxu1 %vm511_vm2, %v3944_v56 }
 0x226   : > { %3359 = vmatmul.msk.f32.gmra.mxu2 %vm511_vm2, %v3911_v33  ;;  %v837_v33 = vadd.f32 %v4145_v44, %v3882_v18 }
 0x228   : > { %v1298_v25 = vpop.f32.mrf.mxu3 }
 0x229   : > { %v1388_v60 = vadd.f32 %v1298_v25, %v1112_v1  ;;  %v1850_v32 = vpop.f32.mrf.mxu2  ;;  %v5157_v1 = vld [vmem:[#allocation3_spill] sm:$0xff] }
 0x22a   : > { %v839_v25 = vadd.f32 %v4145_v44, %v5157_v1 }
 0x22b   : > { %v1664_v21 = vadd.f32 %v4182_v59, %v1388_v60  ;;  %3428 = vmatmul.msk.f32.gmra.mxu0 %vm511_vm2, %v3966_v9  ;;  %v1113_v9 = vadd.f32 %v4261_v40, %v837_v33 }
 0x22d   : > { %v4473_v56 = vadd.f32 %v1850_v32, %v1664_v21  ;;  %3292 = vmatmul.msk.f32.gmra.mxu3 %vm511_vm2, %v4467_v57  ;;  %3445 = vmatmul.msk.f32.gmra.mxu1 %vm511_vm2, %v3962_v6  ;;  %v4495_v6 = vpop.f32.mrf.mxu1 }
 0x22e   : > { %3360 = vmatmul.msk.f32.gmra.mxu2 %vm511_vm2, %v3932_v48  ;;  %v5156_v48 = vld [vmem:[#allocation5_spill] sm:$0xff] }
 0x230   : > { %v1301_v50 = vpop.f32.mrf.mxu3 }
 0x231   : > { %v1389_v59 = vadd.f32 %v1301_v50, %v1113_v9  ;;  %v1853_v15 = vpop.f32.mrf.mxu2  ;;  %v4525_v50 = vld [vmem:[#allocation2 + $0x171] sm:$0xff] }
 0x233   : > { %v1665_v18 = vadd.f32 %v4199_v0, %v1389_v59  ;;  %3429 = vmatmul.msk.f32.gmra.mxu0 %vm511_vm2, %v3984_v27  ;;  %v1114_v27 = vadd.f32 %v4284_v22, %v838_v54  ;;  %v4500_v0 = vpop.f32.mrf.mxu0  ;;  %v5159_v59 = vld [vmem:[#allocation4_spill] sm:$0xff] }
 0x235   : > { %v4489_v43 = vadd.f32 %v1853_v15, %v1665_v18  ;;  %3293 = vmatmul.msk.f32.gmra.mxu3 %vm511_vm2, %v4485_v49  ;;  %3446 = vmatmul.msk.f32.gmra.mxu1 %vm511_vm2, %v3980_v24  ;;  %v5158_v24 = vld [vmem:[#allocation7_spill] sm:$0xff]  ;;  %v4518_v22 = vpop.f32.mrf.mxu1  ;;  %v840_v15 = vadd.f32 %v4145_v44, %v5159_v59 }
 0x236   : > { %3361 = vmatmul.msk.f32.gmra.mxu2 %vm511_vm2, %v5156_v48 }
 0x238   : > { %v1304_v40 = vpop.f32.mrf.mxu3 }
 0x239   : > { %v1390_v2 = vadd.f32 %v1304_v40, %v1114_v27  ;;  %v1856_v28 = vpop.f32.mrf.mxu2  ;;  %v5161_v40 = vld [vmem:[#allocation41_spill] sm:$0xff] }
 0x23b   : > { %v1666_v4 = vadd.f32 %v4222_v19, %v1390_v2  ;;  %3430 = vmatmul.msk.f32.gmra.mxu0 %vm511_vm2, %v4002_v51  ;;  %v1115_v19 = vadd.f32 %v4307_v10, %v839_v25  ;;  %v4520_v32 = vpop.f32.mrf.mxu0  ;;  %v5160_v10 = vld [vmem:[#allocation9_spill] sm:$0xff] }
 0x23d   : > { %v4509_v60 = vadd.f32 %v1856_v28, %v1666_v4  ;;  %3294 = vmatmul.msk.f32.gmra.mxu3 %vm511_vm2, %v4505_v23  ;;  %3447 = vmatmul.msk.f32.gmra.mxu1 %vm511_vm2, %v3998_v42  ;;  %v4538_v48 = vpop.f32.mrf.mxu1  ;;  %v4545_v28 = vld [vmem:[#allocation2 + $0x189] sm:$0xff]  ;;  %v5162_v4 = vld [vmem:[#allocation6_spill] sm:$0xff] }
 0x23e   : > { %3362 = vmatmul.msk.f32.gmra.mxu2 %vm511_vm2, %v5158_v24  ;;  %v841_v1 = vadd.f32 %v4145_v44, %v5162_v4  ;;  %v5168_v4 = vld [vmem:[#allocation19_spill] sm:$0xff] }
 0x240   : > { %v1307_v51 = vpop.f32.mrf.mxu3  ;;  %v1117_v25 = vadd.f32 %v4351_v13, %v841_v1  ;;  %v5165_v13 = vld [vmem:[#allocation13_spill] sm:$0xff] }
 0x241   : > { %v1391_v21 = vadd.f32 %v1307_v51, %v1115_v19  ;;  %v1859_v33 = vpop.f32.mrf.mxu2 }
 0x243   : > { %v1667_v9 = vadd.f32 %v4241_v30, %v1391_v21  ;;  %3431 = vmatmul.msk.f32.gmra.mxu0 %vm511_vm2, %v4020_v26  ;;  %v1116_v30 = vadd.f32 %v4327_v53, %v840_v15  ;;  %v4540_v27 = vpop.f32.mrf.mxu0  ;;  %v5163_v53 = vld [vmem:[#allocation11_spill] sm:$0xff] }
 0x245   : > { %v4529_v42 = vadd.f32 %v1859_v33, %v1667_v9  ;;  %3295 = vmatmul.msk.f32.gmra.mxu3 %vm511_vm2, %v4525_v50  ;;  %3448 = vmatmul.msk.f32.gmra.mxu1 %vm511_vm2, %v4016_v39  ;;  %v4561_v21 = vpop.f32.mrf.mxu1  ;;  %v4563_v33 = vld [vmem:[#allocation2 + $0x191] sm:$0xff]  ;;  %v5164_v9 = vld [vmem:[#allocation8_spill] sm:$0xff] }
 0x246   : > { %3363 = vmatmul.msk.f32.gmra.mxu2 %vm511_vm2, %v5160_v10  ;;  %v842_v59 = vadd.f32 %v4145_v44, %v5164_v9 }
 0x248   : > { %v1310_v18 = vpop.f32.mrf.mxu3 }
 0x249   : > { %v1392_v26 = vadd.f32 %v1310_v18, %v1116_v30  ;;  %v1862_v54 = vpop.f32.mrf.mxu2 }
 0x24b   : > { %v1668_v2 = vadd.f32 %v5161_v40, %v1392_v26  ;;  %3432 = vmatmul.msk.f32.gmra.mxu0 %vm511_vm2, %v4044_v35  ;;  %v4567_v15 = vpop.f32.mrf.mxu0  ;;  %v4581_v26 = vld [vmem:[#allocation2 + $0x1a9] sm:$0xff] }
 0x24d   : > { %v4549_v39 = vadd.f32 %v1862_v54, %v1668_v2  ;;  %3296 = vmatmul.msk.f32.gmra.mxu3 %vm511_vm2, %v4545_v28  ;;  %3449 = vmatmul.msk.f32.gmra.mxu1 %vm511_vm2, %v4037_v16  ;;  %v5166_v54 = vld [vmem:[#allocation10_spill] sm:$0xff] }
 0x24e   : > { %3364 = vmatmul.msk.f32.gmra.mxu2 %vm511_vm2, %v5163_v53  ;;  %v843_v40 = vadd.f32 %v4145_v44, %v5166_v54  ;;  %v5172_v54 = vld [vmem:[#allocation14_spill] sm:$0xff] }
 0x250   : > { %v1313_v24 = vpop.f32.mrf.mxu3 }
 0x251   : > { %v1393_v35 = vadd.f32 %v1313_v24, %v1117_v25  ;;  %v1865_v19 = vpop.f32.mrf.mxu2 }
 0x253   : > { %v1669_v51 = vadd.f32 %v4280_v31, %v1393_v35  ;;  %3433 = vmatmul.msk.f32.gmra.mxu0 %vm511_vm2, %v4068_v58  ;;  %v1118_v58 = vadd.f32 %v4376_v46, %v842_v59  ;;  %v4591_v46 = vpop.f32.mrf.mxu1  ;;  %v4601_v35 = vld [vmem:[#allocation2 + $0x1b1] sm:$0xff] }
 0x254   : > { %v5171_v59 = vld [vmem:[#allocation22_spill] sm:$0xff] }
 0x255   : > { %v4569_v16 = vadd.f32 %v1865_v19, %v1669_v51  ;;  %3297 = vmatmul.msk.f32.gmra.mxu3 %vm511_vm2, %v4563_v33  ;;  %3450 = vmatmul.msk.f32.gmra.mxu1 %vm511_vm2, %v4061_v37  ;;  %v5167_v37 = vld [vmem:[#allocation15_spill] sm:$0xff]  ;;  %v5169_v19 = vld [vmem:[#allocation12_spill] sm:$0xff] }
 0x256   : > { %3365 = vmatmul.msk.f32.gmra.mxu2 %vm511_vm2, %v5165_v13  ;;  %v844_v51 = vadd.f32 %v4145_v44, %v5169_v19  ;;  %v4640_v19 = vld [vmem:[#allocation2 + $0x1d1] sm:$0xff] }
 0x258   : > { %v1316_v31 = vpop.f32.mrf.mxu3 }
 0x259   : > { %v1394_v10 = vadd.f32 %v1316_v31, %v1118_v58  ;;  %v1868_v30 = vpop.f32.mrf.mxu2 }
 0x25b   : > { %v1670_v18 = vadd.f32 %v4303_v12, %v1394_v10  ;;  %3434 = vmatmul.msk.f32.gmra.mxu0 %vm511_vm2, %v4089_v3  ;;  %v1119_v3 = vadd.f32 %v4404_v55, %v843_v40  ;;  %v4596_v12 = vpop.f32.mrf.mxu0  ;;  %v5170_v55 = vld [vmem:[#allocation17_spill] sm:$0xff]  ;;  %v4614_v13 = vpop.f32.mrf.mxu1  ;;  %v845_v40 = vadd.f32 %v4145_v44, %v5172_v54 }
 0x25d   : > { %v4585_v2 = vadd.f32 %v1868_v30, %v1670_v18  ;;  %3298 = vmatmul.msk.f32.gmra.mxu3 %vm511_vm2, %v4581_v26  ;;  %3451 = vmatmul.msk.f32.gmra.mxu1 %vm511_vm2, %v5168_v4  ;;  %v4621_v18 = vld [vmem:[#allocation2 + $0x1c9] sm:$0xff] }
 0x25e   : > { %3366 = vmatmul.msk.f32.gmra.mxu2 %vm511_vm2, %v5167_v37  ;;  %v2533_v4 = vld [vmem:[#allocation2 + $0xf0] sm:$0xff] }
 0x260   : > { %v1319_v1 = vpop.f32.mrf.mxu3 }
 0x261   : > { %v1395_v53 = vadd.f32 %v1319_v1, %v1119_v3  ;;  %v1871_v25 = vpop.f32.mrf.mxu2 }
 0x263   : > { %v1671_v24 = vadd.f32 %v4325_v38, %v1395_v53  ;;  %3435 = vmatmul.msk.f32.gmra.mxu0 %vm511_vm2, %v4107_v34  ;;  %v1120_v38 = vadd.f32 %v4424_v61, %v844_v51  ;;  %v4616_v58 = vpop.f32.mrf.mxu0  ;;  %v5173_v61 = vld [vmem:[#allocation20_spill] sm:$0xff]  ;;  %v4633_v53 = vpop.f32.mrf.mxu1 }
 0x264   : > { %v5174_v51 = vld [vmem:[#allocation16_spill] sm:$0xff] }
 0x265   : > { %v4605_v9 = vadd.f32 %v1871_v25, %v1671_v24  ;;  %3299 = vmatmul.msk.f32.gmra.mxu3 %vm511_vm2, %v4601_v35  ;;  %3452 = vmatmul.msk.f32.gmra.mxu1 %vm511_vm2, %v5171_v59 }
 0x266   : > { %3367 = vmatmul.msk.f32.gmra.mxu2 %vm511_vm2, %v5170_v55  ;;  %v846_v55 = vadd.f32 %v4145_v44, %v5174_v51 }
 0x268   : > { %v1322_v34 = vpop.f32.mrf.mxu3 }
 0x269   : > { %v1396_v31 = vadd.f32 %v1322_v34, %v1120_v38  ;;  %v1874_v10 = vpop.f32.mrf.mxu2  ;;  %v2534_v38 = vld [vmem:[#allocation2 + $0x108] sm:$0xff] }
 0x26b   : > { %v1672_v30 = vadd.f32 %v4349_v52, %v1396_v31  ;;  %3436 = vmatmul.msk.f32.gmra.mxu0 %vm511_vm2, %v4370_v7  ;;  %v1121_v52 = vadd.f32 %v4444_v8, %v845_v40  ;;  %v4635_v25 = vpop.f32.mrf.mxu0  ;;  %v5175_v8 = vld [vmem:[#allocation23_spill] sm:$0xff]  ;;  %v4655_v40 = vpop.f32.mrf.mxu1 }
 0x26d   : > { %v4625_v37 = vadd.f32 %v1874_v10, %v1672_v30  ;;  %3300 = vmatmul.msk.f32.gmra.mxu3 %vm511_vm2, %v4621_v18  ;;  %3453 = vmatmul.msk.f32.gmra.mxu1 %vm511_vm2, %v2533_v4  ;;  %v4652_v10 = vld [vmem:[#allocation2 + $0x208] sm:$0xff]  ;;  %v5176_v30 = vld [vmem:[#allocation58_spill] sm:$0xff] }
 0x26e   : > { %3368 = vmatmul.msk.f32.gmra.mxu2 %vm511_vm2, %v5173_v61  ;;  %v4657_v61 = vld [vmem:[#allocation2 + $0x1e9] sm:$0xff]  ;;  %v5177_v4 = vld [vmem:[#allocation18_spill] sm:$0xff] }
 0x270   : > { %v1325_v3 = vpop.f32.mrf.mxu3 }
 0x271   : > { %v1397_v7 = vadd.f32 %v1325_v3, %v1121_v52  ;;  %v1877_v1 = vpop.f32.mrf.mxu2  ;;  %v847_v52 = vadd.f32 %v4145_v44, %v5177_v4 }
 0x273   : > { %v1673_v24 = vadd.f32 %v4372_v5, %v1397_v7  ;;  %3437 = vmatmul.msk.f32.gmra.mxu0 %vm511_vm2, %v4389_v62  ;;  %v1122_v5 = vadd.f32 %v4471_v17, %v846_v55  ;;  %v2535_v17 = vld [vmem:[#allocation2 + $0x110] sm:$0xff]  ;;  %v1123_v7 = vadd.f32 %v4500_v0, %v847_v52  ;;  %v2536_v0 = vld [vmem:[#allocation2 + $0x128] sm:$0xff] }
 0x274   : > { %v4669_v55 = vld [vmem:[#allocation2 + $0x210] sm:$0xff] }
 0x275   : > { %v4644_v59 = vadd.f32 %v1877_v1, %v1673_v24  ;;  %3301 = vmatmul.msk.f32.gmra.mxu3 %vm511_vm2, %v4640_v19  ;;  %3454 = vmatmul.msk.f32.gmra.mxu1 %vm511_vm2, %v2534_v38  ;;  %v4672_v38 = vld [vmem:[#allocation2 + $0x1f1] sm:$0xff] }
 0x276   : > { %3369 = vmatmul.msk.f32.gmra.mxu2 %vm511_vm2, %v5175_v8 }
 0x278   : > { %v1328_v34 = vpop.f32.mrf.mxu3 }
 0x279   : > { %v1398_v62 = vadd.f32 %v1328_v34, %v1122_v5  ;;  %v1880_v31 = vpop.f32.mrf.mxu2  ;;  %v5178_v5 = vld [vmem:[#allocation21_spill] sm:$0xff] }
 0x27a   : > { %v848_v34 = vadd.f32 %v4145_v44, %v5178_v5  ;;  %v5183_v5 = vld [vmem:[#allocation32_spill] sm:$0xff] }
 0x27b   : > { %v1674_v54 = vadd.f32 %v5176_v30, %v1398_v62  ;;  %v5179_v30 = vld [vmem:[#allocation24_spill] sm:$0xff] }
 0x27d   : > { %v4661_v3 = vadd.f32 %v1880_v31, %v1674_v54  ;;  %3302 = vmatmul.msk.f32.gmra.mxu3 %vm511_vm2, %v4657_v61  ;;  %3455 = vmatmul.msk.f32.gmra.mxu1 %vm511_vm2, %v2535_v17  ;;  %v4682_v31 = vpop.f32.mrf.mxu1 }
 0x27e   : > { %3370 = vmatmul.msk.f32.gmra.mxu2 %vm511_vm2, %v4652_v10 }
 0x280   : > { %v1331_v1 = vpop.f32.mrf.mxu3 }
 0x281   : > { %v1399_v24 = vadd.f32 %v1331_v1, %v1123_v7  ;;  %v1883_v51 = vpop.f32.mrf.mxu2  ;;  %v5180_v7 = vld [vmem:[#allocation25_spill] sm:$0xff] }
 0x282   : > { %v849_v1 = vadd.f32 %v4145_v44, %v5180_v7  ;;  %v5186_v7 = vld [vmem:[#allocation34_spill] sm:$0xff] }
 0x283   : > { %v1675_v8 = vadd.f32 %v4422_v36, %v1399_v24  ;;  %v1124_v36 = vadd.f32 %v5179_v30, %v848_v34  ;;  %v5184_v34 = vld [vmem:[#allocation26_spill] sm:$0xff] }
 0x285   : > { %v4676_v62 = vadd.f32 %v1883_v51, %v1675_v8  ;;  %3303 = vmatmul.msk.f32.gmra.mxu3 %vm511_vm2, %v4672_v38  ;;  %3456 = vmatmul.msk.f32.gmra.mxu1 %vm511_vm2, %v2536_v0  ;;  %v5182_v51 = vld [vmem:[#allocation28_spill] sm:$0xff]  ;;  %v2537_v8 = vld [vmem:[#allocation2 + $0x130] sm:$0xff]  ;;  %v1125_v0 = vadd.f32 %v5184_v34, %v849_v1  ;;  %v4697_v30 = vpop.f32.mrf.mxu1  ;;  %v5187_v1 = vld [vmem:[#allocation27_spill] sm:$0xff] }
 0x286   : > { %3371 = vmatmul.msk.f32.gmra.mxu2 %vm511_vm2, %v4669_v55 }
 0x288   : > { %v1334_v54 = vpop.f32.mrf.mxu3 }
 0x289   : > { %v1400_v4 = vadd.f32 %v1334_v54, %v1124_v36  ;;  %v1886_v52 = vpop.f32.mrf.mxu2 }
 0x28b   : > { %v1676_v17 = vadd.f32 %v4442_v47, %v1400_v4 }
 0x28d   : > { %v4689_v24 = vadd.f32 %v1886_v52, %v1676_v17  ;;  %3374 = vmatmul.msk.f32.vlgmr.msra.gmra.mxu3 %vm511_vm2, %v5182_v51  ;;  %3457 = vmatmul.msk.f32.gmra.mxu1 %vm511_vm2, %v2537_v8  ;;  %v5185_v52 = vld [vmem:[#allocation30_spill] sm:$0xff]  ;;  %v2538_v17 = vld [vmem:[#allocation2 + $0x148] sm:$0xff] }
 0x28e   : > { %3476 = vmatmul.msk.f32.vlgmr.msra.gmra.mxu2 %vm511_vm2, %v5183_v5 }
 0x28f   : > { %5181 = vst [vmem:[#allocation5_spill] sm:$0xff] %v4689_v24  ;;  %v4708_v24 = vpop.f32.mrf.mxu1 }
 0x290   : > { %v1337_v36 = vpop.f32.mrf.mxu3 }
 0x291   : > { %v1401_v47 = vadd.f32 %v1337_v36, %v1125_v0  ;;  %v1889_v54 = vpop.f32.mrf.mxu2  ;;  %v2539_v36 = vld [vmem:[#allocation2 + $0x150] sm:$0xff] }
 0x293   : > { %v1677_v44 = vadd.f32 %v4465_v11, %v1401_v47  ;;  %v5189_v47 = vld [vmem:[#allocation36_spill] sm:$0xff] }
 0x295   : > { %v4700_v4 = vadd.f32 %v1889_v54, %v1677_v44  ;;  %3375 = vmatmul.msk.f32.gmra.mxu3 %vm511_vm2, %v5185_v52  ;;  %3458 = vmatmul.msk.f32.gmra.mxu1 %vm511_vm2, %v2538_v17  ;;  %v5190_v44 = vld [vmem:[#allocation29_spill] sm:$0xff] }
 0x296   : > { %3477 = vmatmul.msk.f32.gmra.mxu2 %vm511_vm2, %v5186_v7 }
 0x298   : > { %v1340_v51 = vpop.f32.mrf.mxu3 }
 0x299   : > { %v1402_v8 = vadd.f32 %v1340_v51, %v5187_v1  ;;  %v1892_v34 = vpop.f32.mrf.mxu2  ;;  %v4720_v1 = vpop.f32.mrf.mxu1 }
 0x29b   : > { %v1678_v0 = vadd.f32 %v4495_v6, %v1402_v8  ;;  %v5192_v8 = vld [vmem:[#allocation38_spill] sm:$0xff] }
 0x29d   : > { %v4711_v11 = vadd.f32 %v1892_v34, %v1678_v0  ;;  %3376 = vmatmul.msk.f32.gmra.mxu3 %vm511_vm2, %v5183_v5  ;;  %3459 = vmatmul.msk.f32.gmra.mxu1 %vm511_vm2, %v2539_v36  ;;  %v2540_v5 = vld [vmem:[#allocation2 + $0x168] sm:$0xff]  ;;  %v5193_v0 = vld [vmem:[#allocation31_spill] sm:$0xff] }
 0x29e   : > { %3478 = vmatmul.msk.f32.gmra.mxu2 %vm511_vm2, %v5189_v47 }
 0x29f   : > { %5188 = vst [vmem:[#allocation3_spill] sm:$0xff] %v4711_v11 }
 0x2a0   : > { %v1343_v54 = vpop.f32.mrf.mxu3 }
 0x2a1   : > { %v1403_v52 = vadd.f32 %v1343_v54, %v5190_v44  ;;  %v1895_v17 = vpop.f32.mrf.mxu2 }
 0x2a3   : > { %v1679_v51 = vadd.f32 %v4518_v22, %v1403_v52  ;;  %v2541_v52 = vld [vmem:[#allocation2 + $0x170] sm:$0xff] }
 0x2a5   : > { %v4722_v6 = vadd.f32 %v1895_v17, %v1679_v51  ;;  %3377 = vmatmul.msk.f32.gmra.mxu3 %vm511_vm2, %v5186_v7  ;;  %3460 = vmatmul.msk.f32.gmra.mxu1 %vm511_vm2, %v2540_v5  ;;  %v5195_v17 = vld [vmem:[#allocation40_spill] sm:$0xff]  ;;  %v4737_v7 = vpop.f32.mrf.mxu1  ;;  %v5196_v5 = vld [vmem:[#allocation33_spill] sm:$0xff] }
 0x2a6   : > { %3479 = vmatmul.msk.f32.gmra.mxu2 %vm511_vm2, %v5192_v8 }
 0x2a7   : > { %5191 = vst [vmem:[#allocation7_spill] sm:$0xff] %v4722_v6 }
 0x2a8   : > { %v1346_v34 = vpop.f32.mrf.mxu3 }
 0x2a9   : > { %v1404_v36 = vadd.f32 %v1346_v34, %v5193_v0  ;;  %v1898_v54 = vpop.f32.mrf.mxu2 }
 0x2ab   : > { %v1680_v44 = vadd.f32 %v4538_v48, %v1404_v36  ;;  %v5198_v36 = vld [vmem:[#allocation43_spill] sm:$0xff] }
 0x2ad   : > { %v4731_v22 = vadd.f32 %v1898_v54, %v1680_v44  ;;  %3378 = vmatmul.msk.f32.gmra.mxu3 %vm511_vm2, %v5189_v47  ;;  %3461 = vmatmul.msk.f32.gmra.mxu1 %vm511_vm2, %v2541_v52  ;;  %v2542_v47 = vld [vmem:[#allocation2 + $0x188] sm:$0xff]  ;;  %v4749_v54 = vpop.f32.mrf.mxu1  ;;  %v5199_v52 = vld [vmem:[#allocation35_spill] sm:$0xff] }
 0x2ae   : > { %3480 = vmatmul.msk.f32.gmra.mxu2 %vm511_vm2, %v5195_v17 }
 0x2af   : > { %5194 = vst [vmem:[#allocation4_spill] sm:$0xff] %v4731_v22 }
 0x2b0   : > { %v1349_v51 = vpop.f32.mrf.mxu3 }
 0x2b1   : > { %v1405_v6 = vadd.f32 %v1349_v51, %v5196_v5  ;;  %v1901_v34 = vpop.f32.mrf.mxu2 }
 0x2b3   : > { %v1681_v0 = vadd.f32 %v4561_v21, %v1405_v6  ;;  %v2543_v6 = vld [vmem:[#allocation2 + $0x190] sm:$0xff] }
 0x2b5   : > { %v4742_v48 = vadd.f32 %v1901_v34, %v1681_v0  ;;  %3379 = vmatmul.msk.f32.gmra.mxu3 %vm511_vm2, %v5192_v8  ;;  %3462 = vmatmul.msk.f32.gmra.mxu1 %vm511_vm2, %v2542_v47  ;;  %v5200_v8 = vld [vmem:[#allocation45_spill] sm:$0xff]  ;;  %v4761_v11 = vpop.f32.mrf.mxu1 }
 0x2b6   : > { %3481 = vmatmul.msk.f32.gmra.mxu2 %vm511_vm2, %v5198_v36  ;;  %v5201_v0 = vld [vmem:[#allocation37_spill] sm:$0xff] }
 0x2b7   : > { %5197 = vst [vmem:[#allocation9_spill] sm:$0xff] %v4742_v48 }
 0x2b8   : > { %v1352_v44 = vpop.f32.mrf.mxu3 }
 0x2b9   : > { %v1406_v22 = vadd.f32 %v1352_v44, %v5199_v52  ;;  %v1904_v51 = vpop.f32.mrf.mxu2 }
 0x2bb   : > { %v1682_v5 = vadd.f32 %v4591_v46, %v1406_v22  ;;  %v2544_v22 = vld [vmem:[#allocation2 + $0x1a8] sm:$0xff] }
 0x2bd   : > { %v4753_v21 = vadd.f32 %v1904_v51, %v1682_v5  ;;  %3380 = vmatmul.msk.f32.gmra.mxu3 %vm511_vm2, %v5195_v17  ;;  %3463 = vmatmul.msk.f32.gmra.mxu1 %vm511_vm2, %v2543_v6  ;;  %v5203_v17 = vld [vmem:[#allocation47_spill] sm:$0xff] }
 0x2be   : > { %3482 = vmatmul.msk.f32.gmra.mxu2 %vm511_vm2, %v5200_v8  ;;  %v5204_v51 = vld [vmem:[#allocation39_spill] sm:$0xff] }
 0x2c0   : > { %v1355_v34 = vpop.f32.mrf.mxu3 }
 0x2c1   : > { %v1407_v47 = vadd.f32 %v1355_v34, %v5201_v0  ;;  %v1907_v48 = vpop.f32.mrf.mxu2  ;;  %v4773_v0 = vpop.f32.mrf.mxu1 }
 0x2c3   : > { %v1683_v44 = vadd.f32 %v4614_v13, %v1407_v47 }
 0x2c5   : > { %v4764_v46 = vadd.f32 %v1907_v48, %v1683_v44  ;;  %3381 = vmatmul.msk.f32.gmra.mxu3 %vm511_vm2, %v5198_v36  ;;  %3464 = vmatmul.msk.f32.gmra.mxu1 %vm511_vm2, %v2544_v22  ;;  %v2545_v48 = vld [vmem:[#allocation2 + $0x1b0] sm:$0xff]  ;;  %v5207_v44 = vld [vmem:[#allocation42_spill] sm:$0xff] }
 0x2c6   : > { %3483 = vmatmul.msk.f32.gmra.mxu2 %vm511_vm2, %v5203_v17  ;;  %v5206_v36 = vld [vmem:[#allocation49_spill] sm:$0xff] }
 0x2c7   : > { %5202 = vst [vmem:[#allocation41_spill] sm:$0xff] %v4764_v46 }
 0x2c8   : > { %v1358_v52 = vpop.f32.mrf.mxu3 }
 0x2c9   : > { %v1408_v5 = vadd.f32 %v1358_v52, %v5204_v51  ;;  %v1910_v6 = vpop.f32.mrf.mxu2 }
 0x2cb   : > { %v1684_v34 = vadd.f32 %v4633_v53, %v1408_v5  ;;  %v2546_v5 = vld [vmem:[#allocation2 + $0x1c8] sm:$0xff] }
 0x2cd   : > { %v4775_v13 = vadd.f32 %v1910_v6, %v1684_v34  ;;  %3382 = vmatmul.msk.f32.gmra.mxu3 %vm511_vm2, %v5200_v8  ;;  %3465 = vmatmul.msk.f32.gmra.mxu1 %vm511_vm2, %v2545_v48  ;;  %v5209_v6 = vld [vmem:[#allocation51_spill] sm:$0xff]  ;;  %v4790_v8 = vpop.f32.mrf.mxu1  ;;  %v5210_v48 = vld [vmem:[#allocation44_spill] sm:$0xff] }
 0x2ce   : > { %3484 = vmatmul.msk.f32.gmra.mxu2 %vm511_vm2, %v5206_v36 }
 0x2cf   : > { %5205 = vst [vmem:[#allocation6_spill] sm:$0xff] %v4775_v13 }
 0x2d0   : > { %v1361_v47 = vpop.f32.mrf.mxu3 }
 0x2d1   : > { %v1409_v22 = vadd.f32 %v1361_v47, %v5207_v44  ;;  %v1913_v52 = vpop.f32.mrf.mxu2 }
 0x2d3   : > { %v1685_v51 = vadd.f32 %v4655_v40, %v1409_v22  ;;  %v5212_v22 = vld [vmem:[#allocation53_spill] sm:$0xff] }
 0x2d5   : > { %v4784_v53 = vadd.f32 %v1913_v52, %v1685_v51  ;;  %3383 = vmatmul.msk.f32.gmra.mxu3 %vm511_vm2, %v5203_v17  ;;  %3466 = vmatmul.msk.f32.gmra.mxu1 %vm511_vm2, %v2546_v5  ;;  %v2547_v17 = vld [vmem:[#allocation2 + $0x1d0] sm:$0xff]  ;;  %v4802_v52 = vpop.f32.mrf.mxu1  ;;  %v5213_v5 = vld [vmem:[#allocation46_spill] sm:$0xff] }
 0x2d6   : > { %3485 = vmatmul.msk.f32.gmra.mxu2 %vm511_vm2, %v5209_v6 }
 0x2d7   : > { %5208 = vst [vmem:[#allocation11_spill] sm:$0xff] %v4784_v53 }
 0x2d8   : > { %v1364_v34 = vpop.f32.mrf.mxu3 }
 0x2d9   : > { %v1410_v13 = vadd.f32 %v1364_v34, %v5210_v48  ;;  %v1916_v47 = vpop.f32.mrf.mxu2 }
 0x2db   : > { %v1686_v44 = vadd.f32 %v4682_v31, %v1410_v13  ;;  %v2548_v13 = vld [vmem:[#allocation2 + $0x1e8] sm:$0xff] }
 0x2dd   : > { %v4795_v40 = vadd.f32 %v1916_v47, %v1686_v44  ;;  %3384 = vmatmul.msk.f32.gmra.mxu3 %vm511_vm2, %v5206_v36  ;;  %3467 = vmatmul.msk.f32.gmra.mxu1 %vm511_vm2, %v2547_v17  ;;  %v5214_v36 = vld [vmem:[#allocation55_spill] sm:$0xff]  ;;  %v5215_v44 = vld [vmem:[#allocation48_spill] sm:$0xff]  ;;  %v4814_v46 = vpop.f32.mrf.mxu1 }
 0x2de   : > { %3486 = vmatmul.msk.f32.gmra.mxu2 %vm511_vm2, %v5212_v22 }
 0x2df   : > { %5211 = vst [vmem:[#allocation8_spill] sm:$0xff] %v4795_v40 }
 0x2e0   : > { %v1367_v51 = vpop.f32.mrf.mxu3 }
 0x2e1   : > { %v1411_v53 = vadd.f32 %v1367_v51, %v5213_v5  ;;  %v1919_v34 = vpop.f32.mrf.mxu2 }
 0x2e3   : > { %v1687_v48 = vadd.f32 %v4697_v30, %v1411_v53  ;;  %v2549_v53 = vld [vmem:[#allocation2 + $0x1f0] sm:$0xff] }
 0x2e5   : > { %v4806_v31 = vadd.f32 %v1919_v34, %v1687_v48  ;;  %3385 = vmatmul.msk.f32.gmra.mxu3 %vm511_vm2, %v5209_v6  ;;  %3468 = vmatmul.msk.f32.gmra.mxu1 %vm511_vm2, %v2548_v13  ;;  %v5216_v6 = vld [vmem:[#allocation57_spill] sm:$0xff]  ;;  %v5217_v34 = vld [vmem:[#allocation50_spill] sm:$0xff] }
 0x2e6   : > { %3487 = vmatmul.msk.f32.gmra.mxu2 %vm511_vm2, %v5214_v36 }
 0x2e8   : > { %v1370_v47 = vpop.f32.mrf.mxu3 }
 0x2e9   : > { %v1412_v17 = vadd.f32 %v1370_v47, %v5215_v44  ;;  %v1922_v40 = vpop.f32.mrf.mxu2  ;;  %v4826_v44 = vpop.f32.mrf.mxu1 }
 0x2eb   : > { %v1688_v51 = vadd.f32 %v4708_v24, %v1412_v17 }
 0x2ed   : > { %v4817_v30 = vadd.f32 %v1922_v40, %v1688_v51  ;;  %3386 = vmatmul.msk.f32.gmra.mxu3 %vm511_vm2, %v5212_v22  ;;  %3469 = vmatmul.msk.f32.gmra.mxu1 %vm511_vm2, %v2549_v53  ;;  %v5218_v22 = vld [vmem:[#allocation52_spill] sm:$0xff] }
 0x2ee   : > { %3488 = vmatmul.msk.f32.gmra.mxu2 %vm511_vm2, %v5216_v6 }
 0x2f0   : > { %v1373_v5 = vpop.f32.mrf.mxu3 }
 0x2f1   : > { %v1413_v48 = vadd.f32 %v1373_v5, %v5217_v34  ;;  %v1925_v13 = vpop.f32.mrf.mxu2  ;;  %v5219_v5 = vld [vmem:[#allocation54_spill] sm:$0xff] }
 0x2f3   : > { %v1689_v47 = vadd.f32 %v4720_v1, %v1413_v48 }
 0x2f5   : > { %v4828_v24 = vadd.f32 %v1925_v13, %v1689_v47  ;;  %3387 = vmatmul.msk.f32.gmra.mxu3 %vm511_vm2, %v5214_v36  ;;  %3470 = vmatmul.msk.f32.gmra.mxu1 %vm511_vm2, %v4652_v10  ;;  %v4844_v36 = vpop.f32.mrf.mxu1  ;;  %v5220_v47 = vld [vmem:[#allocation56_spill] sm:$0xff] }
 0x2f6   : > { %3489 = vmatmul.msk.f32.gmra.mxu2 %vm511_vm2, %v4409_v45 }
 0x2f8   : > { %v1376_v40 = vpop.f32.mrf.mxu3 }
 0x2f9   : > { %v1414_v17 = vadd.f32 %v1376_v40, %v5218_v22  ;;  %v1928_v51 = vpop.f32.mrf.mxu2 }
 0x2fb   : > { %v1690_v53 = vadd.f32 %v4737_v7, %v1414_v17 }
 0x2fd   : > { %v4838_v1 = vadd.f32 %v1928_v51, %v1690_v53  ;;  %3388 = vmatmul.msk.f32.gmra.mxu3 %vm511_vm2, %v5216_v6  ;;  %3471 = vmatmul.msk.f32.gmra.mxu1 %vm511_vm2, %v4669_v55 }
 0x2fe   : > { %3490 = vmatmul.msk.f32.gmra.mxu2 %vm511_vm2, %v4429_v14 }
 0x300   : > { %v1379_v10 = vpop.f32.mrf.mxu3 }
 0x301   : > { %v1415_v34 = vadd.f32 %v1379_v10, %v5219_v5  ;;  %v1931_v48 = vpop.f32.mrf.mxu2  ;;  %v4867_v10 = vpop.f32.mrf.mxu1 }
 0x303   : > { %v1691_v13 = vadd.f32 %v4749_v54, %v1415_v34 }
 0x305   : > { %v4850_v7 = vadd.f32 %v1931_v48, %v1691_v13  ;;  %3389 = vmatmul.msk.f32.gmra.mxu3 %vm511_vm2, %v4409_v45  ;;  %v4864_v45 = vpop.f32.mrf.mxu0 }
 0x306   : > { %3491 = vmatmul.msk.f32.gmra.mxu2 %vm511_vm2, %v4449_v20 }
 0x308   : > { %v1382_v6 = vpop.f32.mrf.mxu3 }
 0x309   : > { %v1416_v40 = vadd.f32 %v1382_v6, %v5220_v47  ;;  %v1934_v22 = vpop.f32.mrf.mxu2  ;;  %v4888_v48 = vpop.f32.mrf.mxu1 }
 0x30b   : > { %v1692_v55 = vadd.f32 %v4761_v11, %v1416_v40 }
 0x30d   : > { %v4858_v17 = vadd.f32 %v1934_v22, %v1692_v55  ;;  %3390 = vmatmul.msk.f32.gmra.mxu3 %vm511_vm2, %v4429_v14 }
 0x30e   : > { %3492 = vmatmul.msk.f32.gmra.mxu2 %vm511_vm2, %v4467_v57 }
 0x310   : > { %v2117_v54 = vpop.f32.mrf.mxu3 }
 0x311   : > { %v2213_v51 = vadd.f32 %v2117_v54, %v4413_v63  ;;  %v2946_v53 = vpop.f32.mrf.mxu2 }
 0x313   : > { %v2490_v5 = vadd.f32 %v4520_v32, %v2213_v51 }
 0x315   : > { %v2766_v11 = vadd.f32 %v4773_v0, %v2490_v5  ;;  %3391 = vmatmul.msk.f32.gmra.mxu3 %vm511_vm2, %v4449_v20  ;;  %v4885_v20 = vpop.f32.mrf.mxu0 }
 0x316   : > { %3493 = vmatmul.msk.f32.gmra.mxu2 %vm511_vm2, %v4485_v49 }
 0x317   : > { %v3042_v63 = vadd.f32 %v2946_v53, %v2766_v11 }
 0x318   : > { %v2120_v14 = vpop.f32.mrf.mxu3 }
 0x319   : > { %3075 = vst.msk [vmem:[%s4880_s30] sm:$0xff] %vm3074_vm3, %v3042_v63  ;;  %v2214_v32 = vadd.f32 %v2120_v14, %v4433_v29  ;;  %v2949_v0 = vpop.f32.mrf.mxu2 }
 0x31b   : > { %v2491_v34 = vadd.f32 %v4540_v27, %v2214_v32 }
 0x31d   : > { %v2767_v13 = vadd.f32 %v4790_v8, %v2491_v34  ;;  %3392 = vmatmul.msk.f32.gmra.mxu3 %vm511_vm2, %v4467_v57  ;;  %v4899_v22 = vpop.f32.mrf.mxu0  ;;  %v2694_v57 = vpop.f32.mrf.mxu1 }
 0x31e   : > { %3494 = vmatmul.msk.f32.gmra.mxu2 %vm511_vm2, %v4505_v23 }
 0x31f   : > { %v3043_v6 = vadd.f32 %v2949_v0, %v2767_v13 }
 0x320   : > { %v2123_v47 = vpop.f32.mrf.mxu3 }
 0x321   : > { %3076 = vst.msk [vmem:[%s4880_s30 + $0x8] sm:$0xff] %vm3074_vm3, %v3043_v6  ;;  %v2215_v29 = vadd.f32 %v2123_v47, %v4453_v41  ;;  %v2952_v40 = vpop.f32.mrf.mxu2 }
 0x323   : > { %v2492_v27 = vadd.f32 %v4567_v15, %v2215_v29 }
 0x325   : > { %v2768_v8 = vadd.f32 %v4802_v52, %v2492_v27  ;;  %3393 = vmatmul.msk.f32.gmra.mxu3 %vm511_vm2, %v4485_v49  ;;  %v2421_v49 = vpop.f32.mrf.mxu0  ;;  %v2697_v5 = vpop.f32.mrf.mxu1 }
 0x326   : > { %3495 = vmatmul.msk.f32.gmra.mxu2 %vm511_vm2, %v4525_v50 }
 0x327   : > { %v3044_v55 = vadd.f32 %v2952_v40, %v2768_v8 }
 0x328   : > { %v2126_v54 = vpop.f32.mrf.mxu3 }
 0x329   : > { %3077 = vst.msk [vmem:[%s4880_s30 + $0x10] sm:$0xff] %vm3074_vm3, %v3044_v55  ;;  %v2216_v41 = vadd.f32 %v2126_v54, %v4473_v56  ;;  %v2955_v51 = vpop.f32.mrf.mxu2 }
 0x32b   : > { %v2493_v15 = vadd.f32 %v4596_v12, %v2216_v41 }
 0x32d   : > { %v2769_v53 = vadd.f32 %v4814_v46, %v2493_v15  ;;  %3394 = vmatmul.msk.f32.gmra.mxu3 %vm511_vm2, %v4505_v23  ;;  %v2424_v32 = vpop.f32.mrf.mxu0  ;;  %v2700_v34 = vpop.f32.mrf.mxu1 }
 0x32e   : > { %3496 = vmatmul.msk.f32.gmra.mxu2 %vm511_vm2, %v4545_v28 }
 0x32f   : > { %v3045_v52 = vadd.f32 %v2955_v51, %v2769_v53 }
 0x330   : > { %v2129_v11 = vpop.f32.mrf.mxu3 }
 0x331   : > { %3078 = vst.msk [vmem:[%s4880_s30 + $0x18] sm:$0xff] %vm3074_vm3, %v3045_v52  ;;  %v2217_v56 = vadd.f32 %v2129_v11, %v4489_v43  ;;  %v2958_v63 = vpop.f32.mrf.mxu2 }
 0x333   : > { %v2494_v12 = vadd.f32 %v4616_v58, %v2217_v56 }
 0x335   : > { %v2770_v46 = vadd.f32 %v4826_v44, %v2494_v12  ;;  %3395 = vmatmul.msk.f32.gmra.mxu3 %vm511_vm2, %v4525_v50  ;;  %v2427_v47 = vpop.f32.mrf.mxu0 }
 0x336   : > { %3497 = vmatmul.msk.f32.gmra.mxu2 %vm511_vm2, %v4563_v33 }
 0x337   : > { %v3046_v23 = vadd.f32 %v2958_v63, %v2770_v46 }
 0x338   : > { %v2132_v14 = vpop.f32.mrf.mxu3 }
 0x339   : > { %3079 = vst.msk [vmem:[%s4880_s30 + $0x20] sm:$0xff] %vm3074_vm3, %v3046_v23  ;;  %v2218_v0 = vadd.f32 %v2132_v14, %v4509_v60  ;;  %v2961_v43 = vpop.f32.mrf.mxu2 }
 0x33b   : > { %v2495_v58 = vadd.f32 %v4635_v25, %v2218_v0  ;;  %v2703_v25 = vpop.f32.mrf.mxu1 }
 0x33d   : > { %v2771_v44 = vadd.f32 %v4844_v36, %v2495_v58  ;;  %3396 = vmatmul.msk.f32.gmra.mxu3 %vm511_vm2, %v4545_v28 }
 0x33e   : > { %3498 = vmatmul.msk.f32.gmra.mxu2 %vm511_vm2, %v4581_v26 }
 0x33f   : > { %v3047_v50 = vadd.f32 %v2961_v43, %v2771_v44  ;;  %v2277_v44 = vld [vmem:[#allocation2 + $0x22f] sm:$0xff] }
 0x340   : > { %v2135_v13 = vpop.f32.mrf.mxu3 }
 0x341   : > { %3080 = vst.msk [vmem:[%s4880_s30 + $0x28] sm:$0xff] %vm3074_vm3, %v3047_v50  ;;  %v2219_v6 = vadd.f32 %v2135_v13, %v4529_v42  ;;  %v2964_v60 = vpop.f32.mrf.mxu2  ;;  %v2553_v13 = vld [vmem:[#allocation2 + $0x230] sm:$0xff] }
 0x343   : > { %v2496_v29 = vadd.f32 %v4864_v45, %v2219_v6  ;;  %v2430_v45 = vpop.f32.mrf.mxu0 }
 0x345   : > { %v2772_v36 = vadd.f32 %v4867_v10, %v2496_v29  ;;  %3397 = vmatmul.msk.f32.gmra.mxu3 %vm511_vm2, %v4563_v33  ;;  %v2706_v33 = vpop.f32.mrf.mxu1  ;;  %v2827_v29 = vld [vmem:[#allocation2 + $0x211] sm:$0xff] }
 0x346   : > { %3499 = vmatmul.msk.f32.gmra.mxu2 %vm511_vm2, %v4601_v35 }
 0x347   : > { %v3048_v28 = vadd.f32 %v2964_v60, %v2772_v36 }
 0x348   : > { %v2138_v40 = vpop.f32.mrf.mxu3 }
 0x349   : > { %3081 = vst.msk [vmem:[%s4880_s30 + $0x30] sm:$0xff] %vm3074_vm3, %v3048_v28  ;;  %v2220_v42 = vadd.f32 %v2138_v40, %v4549_v39  ;;  %v2967_v27 = vpop.f32.mrf.mxu2 }
 0x34b   : > { %v2497_v8 = vadd.f32 %v4885_v20, %v2220_v42 }
 0x34d   : > { %v2773_v55 = vadd.f32 %v4888_v48, %v2497_v8  ;;  %3398 = vmatmul.msk.f32.gmra.mxu3 %vm511_vm2, %v4581_v26  ;;  %v2433_v26 = vpop.f32.mrf.mxu0  ;;  %v2709_v15 = vpop.f32.mrf.mxu1 }
 0x34e   : > { %3500 = vmatmul.msk.f32.gmra.mxu2 %vm511_vm2, %v4621_v18 }
 0x34f   : > { %v3049_v10 = vadd.f32 %v2967_v27, %v2773_v55 }
 0x350   : > { %v2141_v54 = vpop.f32.mrf.mxu3 }
 0x351   : > { %3082 = vst.msk [vmem:[%s4880_s30 + $0x38] sm:$0xff] %vm3074_vm3, %v3049_v10  ;;  %v2221_v39 = vadd.f32 %v2141_v54, %v4569_v16  ;;  %v2970_v41 = vpop.f32.mrf.mxu2 }
 0x353   : > { %v2498_v20 = vadd.f32 %v4899_v22, %v2221_v39 }
 0x355   : > { %v2774_v51 = vadd.f32 %v2694_v57, %v2498_v20  ;;  %3399 = vmatmul.msk.f32.gmra.mxu3 %vm511_vm2, %v4601_v35  ;;  %v2436_v57 = vpop.f32.mrf.mxu0  ;;  %v2712_v46 = vpop.f32.mrf.mxu1 }
 0x356   : > { %3501 = vmatmul.msk.f32.gmra.mxu2 %vm511_vm2, %v4640_v19 }
 0x357   : > { %v3050_v48 = vadd.f32 %v2970_v41, %v2774_v51  ;;  %v2829_v41 = vld [vmem:[#allocation2 + $0x231] sm:$0xff] }
 0x358   : > { %v2144_v53 = vpop.f32.mrf.mxu3 }
 0x359   : > { %3083 = vst.msk [vmem:[%s4880_s30 + $0x40] sm:$0xff] %vm3074_vm3, %v3050_v48  ;;  %v2222_v52 = vadd.f32 %v2144_v53, %v4585_v2  ;;  %v2973_v16 = vpop.f32.mrf.mxu2 }
 0x35b   : > { %v2499_v11 = vadd.f32 %v2421_v49, %v2222_v52 }
 0x35d   : > { %v2775_v56 = vadd.f32 %v2697_v5, %v2499_v11  ;;  %3400 = vmatmul.msk.f32.gmra.mxu3 %vm511_vm2, %v4621_v18  ;;  %v2276_v18 = vld [vmem:[#allocation2 + $0x227] sm:$0xff]  ;;  %v2439_v0 = vpop.f32.mrf.mxu0 }
 0x35e   : > { %3502 = vmatmul.msk.f32.gmra.mxu2 %vm511_vm2, %v4657_v61  ;;  %3438 = vmatmul.msk.f32.gmra.mxu0 %vm511_vm2, %v2276_v18  ;;  %v2552_v5 = vld [vmem:[#allocation2 + $0x228] sm:$0xff] }
 0x35f   : > { %v3051_v35 = vadd.f32 %v2973_v16, %v2775_v56  ;;  %3472 = vmatmul.msk.f32.gmra.mxu1 %vm511_vm2, %v2552_v5 }
 0x360   : > { %v2147_v22 = vpop.f32.mrf.mxu3 }
 0x361   : > { %3084 = vst.msk [vmem:[%s4880_s30 + $0x48] sm:$0xff] %vm3074_vm3, %v3051_v35  ;;  %v2223_v63 = vadd.f32 %v2147_v22, %v4605_v9  ;;  %v2976_v12 = vpop.f32.mrf.mxu2 }
 0x363   : > { %v2500_v2 = vadd.f32 %v2424_v32, %v2223_v63 }
 0x365   : > { %v2776_v23 = vadd.f32 %v2700_v34, %v2500_v2  ;;  %3401 = vmatmul.msk.f32.gmra.mxu3 %vm511_vm2, %v4640_v19  ;;  %v2715_v19 = vpop.f32.mrf.mxu1  ;;  %v2826_v34 = vld [vmem:[#allocation2 + $0x209] sm:$0xff] }
 0x366   : > { %3503 = vmatmul.msk.f32.gmra.mxu2 %vm511_vm2, %v4672_v38  ;;  %3439 = vmatmul.msk.f32.gmra.mxu0 %vm511_vm2, %v2277_v44 }
 0x367   : > { %v3052_v49 = vadd.f32 %v2976_v12, %v2776_v23  ;;  %3473 = vmatmul.msk.f32.gmra.mxu1 %vm511_vm2, %v2553_v13 }
 0x368   : > { %v2150_v14 = vpop.f32.mrf.mxu3 }
 0x369   : > { %3085 = vst.msk [vmem:[%s4880_s30 + $0x50] sm:$0xff] %vm3074_vm3, %v3052_v49  ;;  %v2224_v9 = vadd.f32 %v2150_v14, %v4625_v37  ;;  %v2979_v32 = vpop.f32.mrf.mxu2  ;;  %v5222_v49 = vld [vmem:[#allocation3_spill] sm:$0xff] }
 0x36b   : > { %v2501_v43 = vadd.f32 %v2427_v47, %v2224_v9 }
 0x36d   : > { %v2777_v58 = vadd.f32 %v2703_v25, %v2501_v43  ;;  %3402 = vmatmul.msk.f32.gmra.mxu3 %vm511_vm2, %v4657_v61  ;;  %v2442_v25 = vpop.f32.mrf.mxu0  ;;  %v2718_v36 = vpop.f32.mrf.mxu1 }
 0x36e   : > { %3504 = vmatmul.msk.f32.gmra.mxu2 %vm511_vm2, %v2826_v34 }
 0x36f   : > { %v3053_v50 = vadd.f32 %v2979_v32, %v2777_v58 }
 0x370   : > { %v2153_v6 = vpop.f32.mrf.mxu3 }
 0x371   : > { %3086 = vst.msk [vmem:[%s4880_s30 + $0x58] sm:$0xff] %vm3074_vm3, %v3053_v50  ;;  %v2225_v37 = vadd.f32 %v2153_v6, %v4644_v59  ;;  %v2982_v60 = vpop.f32.mrf.mxu2  ;;  %v2828_v59 = vld [vmem:[#allocation2 + $0x229] sm:$0xff] }
 0x373   : > { %v2502_v47 = vadd.f32 %v2430_v45, %v2225_v37 }
 0x375   : > { %v2778_v61 = vadd.f32 %v2706_v33, %v2502_v47  ;;  %3403 = vmatmul.msk.f32.gmra.mxu3 %vm511_vm2, %v4672_v38  ;;  %v2445_v38 = vpop.f32.mrf.mxu0  ;;  %v2721_v33 = vpop.f32.mrf.mxu1 }
 0x376   : > { %3505 = vmatmul.msk.f32.gmra.mxu2 %vm511_vm2, %v2827_v29 }
 0x377   : > { %v3054_v28 = vadd.f32 %v2982_v60, %v2778_v61 }
 0x378   : > { %v2156_v40 = vpop.f32.mrf.mxu3 }
 0x379   : > { %3087 = vst.msk [vmem:[%s4880_s30 + $0x60] sm:$0xff] %vm3074_vm3, %v3054_v28  ;;  %v2226_v42 = vadd.f32 %v2156_v40, %v4661_v3  ;;  %v2985_v27 = vpop.f32.mrf.mxu2 }
 0x37b   : > { %v2503_v8 = vadd.f32 %v2433_v26, %v2226_v42 }
 0x37d   : > { %v2779_v45 = vadd.f32 %v2709_v15, %v2503_v8  ;;  %3404 = vmatmul.msk.f32.gmra.mxu3 %vm511_vm2, %v2826_v34  ;;  %v2448_v48 = vpop.f32.mrf.mxu0  ;;  %v5221_v15 = vld [vmem:[#allocation5_spill] sm:$0xff]  ;;  %v2724_v16 = vpop.f32.mrf.mxu1  ;;  %v5223_v34 = vld [vmem:[#allocation7_spill] sm:$0xff] }
 0x37e   : > { %3506 = vmatmul.msk.f32.gmra.mxu2 %vm511_vm2, %v2828_v59  ;;  %v5225_v59 = vld [vmem:[#allocation9_spill] sm:$0xff] }
 0x37f   : > { %v3055_v55 = vadd.f32 %v2985_v27, %v2779_v45 }
 0x380   : > { %v2159_v10 = vpop.f32.mrf.mxu3 }
 0x381   : > { %3088 = vst.msk [vmem:[%s4880_s30 + $0x68] sm:$0xff] %vm3074_vm3, %v3055_v55  ;;  %v2227_v54 = vadd.f32 %v2159_v10, %v4676_v62  ;;  %v2988_v39 = vpop.f32.mrf.mxu2 }
 0x383   : > { %v2504_v3 = vadd.f32 %v2436_v57, %v2227_v54 }
 0x385   : > { %v2780_v20 = vadd.f32 %v2712_v46, %v2504_v3  ;;  %3405 = vmatmul.msk.f32.gmra.mxu3 %vm511_vm2, %v2827_v29  ;;  %v2451_v63 = vpop.f32.mrf.mxu0  ;;  %v2727_v46 = vpop.f32.mrf.mxu1  ;;  %v5224_v29 = vld [vmem:[#allocation4_spill] sm:$0xff] }
 0x386   : > { %3507 = vmatmul.msk.f32.gmra.mxu2 %vm511_vm2, %v2829_v41 }
 0x387   : > { %v3056_v51 = vadd.f32 %v2988_v39, %v2780_v20 }
 0x388   : > { %v2162_v26 = vpop.f32.mrf.mxu3 }
 0x389   : > { %3089 = vst.msk [vmem:[%s4880_s30 + $0x70] sm:$0xff] %vm3074_vm3, %v3056_v51  ;;  %v2228_v53 = vadd.f32 %v2162_v26, %v5221_v15  ;;  %v2991_v52 = vpop.f32.mrf.mxu2 }
 0x38b   : > { %v2505_v62 = vadd.f32 %v2439_v0, %v2228_v53  ;;  %v5226_v53 = vld [vmem:[#allocation41_spill] sm:$0xff] }
 0x38d   : > { %v2781_v11 = vadd.f32 %v2715_v19, %v2505_v62  ;;  %v2454_v32 = vpop.f32.mrf.mxu0  ;;  %v2730_v43 = vpop.f32.mrf.mxu1 }
 0x38f   : > { %v3057_v56 = vadd.f32 %v2991_v52, %v2781_v11 }
 0x390   : > { %v2165_v35 = vpop.f32.mrf.mxu3 }
 0x391   : > { %3090 = vst.msk [vmem:[%s4880_s30 + $0x78] sm:$0xff] %vm3074_vm3, %v3057_v56  ;;  %v2229_v22 = vadd.f32 %v2165_v35, %v4700_v4  ;;  %v2994_v57 = vpop.f32.mrf.mxu2 }
 0x393   : > { %v2506_v12 = vadd.f32 %v2442_v25, %v2229_v22 }
 0x395   : > { %v2782_v2 = vadd.f32 %v2718_v36, %v2506_v12  ;;  %v2457_v6 = vpop.f32.mrf.mxu0  ;;  %v2733_v60 = vpop.f32.mrf.mxu1 }
 0x397   : > { %v3058_v23 = vadd.f32 %v2994_v57, %v2782_v2  ;;  %v5227_v57 = vld [vmem:[#allocation6_spill] sm:$0xff] }
 0x398   : > { %v2168_v18 = vpop.f32.mrf.mxu3 }
 0x399   : > { %3091 = vst.msk [vmem:[%s4880_s30 + $0x80] sm:$0xff] %vm3074_vm3, %v3058_v23  ;;  %v2230_v5 = vadd.f32 %v2168_v18, %v5222_v49  ;;  %v2997_v14 = vpop.f32.mrf.mxu2 }
 0x39b   : > { %v2507_v9 = vadd.f32 %v2445_v38, %v2230_v5 }
 0x39d   : > { %v2783_v0 = vadd.f32 %v2721_v33, %v2507_v9  ;;  %v2460_v27 = vpop.f32.mrf.mxu0  ;;  %v2736_v38 = vpop.f32.mrf.mxu1 }
 0x39f   : > { %v3059_v19 = vadd.f32 %v2997_v14, %v2783_v0  ;;  %v5228_v14 = vld [vmem:[#allocation11_spill] sm:$0xff] }
 0x3a0   : > { %v2171_v4 = vpop.f32.mrf.mxu3 }
 0x3a1   : > { %3092 = vst.msk [vmem:[%s4880_s30 + $0x88] sm:$0xff] %vm3074_vm3, %v3059_v19  ;;  %v2231_v58 = vadd.f32 %v2171_v4, %v5223_v34  ;;  %v3000_v44 = vpop.f32.mrf.mxu2  ;;  %v5229_v34 = vld [vmem:[#allocation8_spill] sm:$0xff] }
 0x3a3   : > { %v2508_v50 = vadd.f32 %v2448_v48, %v2231_v58 }
 0x3a5   : > { %v2784_v13 = vadd.f32 %v2724_v16, %v2508_v50  ;;  %v2463_v3 = vpop.f32.mrf.mxu0  ;;  %v2739_v51 = vpop.f32.mrf.mxu1 }
 0x3a7   : > { %v3060_v37 = vadd.f32 %v3000_v44, %v2784_v13 }
 0x3a8   : > { %v2174_v47 = vpop.f32.mrf.mxu3 }
 0x3a9   : > { %3093 = vst.msk [vmem:[%s4880_s30 + $0x90] sm:$0xff] %vm3074_vm3, %v3060_v37  ;;  %v2232_v25 = vadd.f32 %v2174_v47, %v5224_v29  ;;  %v3003_v61 = vpop.f32.mrf.mxu2 }
 0x3ab   : > { %v2509_v36 = vadd.f32 %v2451_v63, %v2232_v25 }
 0x3ad   : > { %v2785_v28 = vadd.f32 %v2727_v46, %v2509_v36  ;;  %v2466_v11 = vpop.f32.mrf.mxu0  ;;  %v2742_v35 = vpop.f32.mrf.mxu1 }
 0x3af   : > { %v3061_v40 = vadd.f32 %v3003_v61, %v2785_v28 }
 0x3b0   : > { %v2177_v42 = vpop.f32.mrf.mxu3 }
 0x3b1   : > { %3094 = vst.msk [vmem:[%s4880_s30 + $0x98] sm:$0xff] %vm3074_vm3, %v3061_v40  ;;  %v2233_v8 = vadd.f32 %v2177_v42, %v5225_v59  ;;  %v3006_v45 = vpop.f32.mrf.mxu2 }
 0x3b3   : > { %v2510_v55 = vadd.f32 %v2454_v32, %v2233_v8 }
 0x3b5   : > { %v2786_v33 = vadd.f32 %v2730_v43, %v2510_v55  ;;  %v2469_v23 = vpop.f32.mrf.mxu0  ;;  %v2745_v49 = vpop.f32.mrf.mxu1 }
 0x3b7   : > { %v3062_v10 = vadd.f32 %v3006_v45, %v2786_v33 }
 0x3b8   : > { %v2180_v54 = vpop.f32.mrf.mxu3 }
 0x3b9   : > { %3095 = vst.msk [vmem:[%s4880_s30 + $0xa0] sm:$0xff] %vm3074_vm3, %v3062_v10  ;;  %v2234_v39 = vadd.f32 %v2180_v54, %v4753_v21  ;;  %v3009_v41 = vpop.f32.mrf.mxu2 }
 0x3bb   : > { %v2511_v20 = vadd.f32 %v2457_v6, %v2234_v39 }
 0x3bd   : > { %v2787_v26 = vadd.f32 %v2733_v60, %v2511_v20  ;;  %v2472_v50 = vpop.f32.mrf.mxu0  ;;  %v2748_v13 = vpop.f32.mrf.mxu1 }
 0x3bf   : > { %v3063_v48 = vadd.f32 %v3009_v41, %v2787_v26 }
 0x3c0   : > { %v2183_v15 = vpop.f32.mrf.mxu3 }
 0x3c1   : > { %3096 = vst.msk [vmem:[%s4880_s30 + $0xa8] sm:$0xff] %vm3074_vm3, %v3063_v48  ;;  %v2235_v52 = vadd.f32 %v2183_v15, %v5226_v53  ;;  %v3012_v16 = vpop.f32.mrf.mxu2 }
 0x3c3   : > { %v2512_v62 = vadd.f32 %v2460_v27, %v2235_v52 }
 0x3c5   : > { %v2788_v56 = vadd.f32 %v2736_v38, %v2512_v62  ;;  %v2475_v36 = vpop.f32.mrf.mxu0  ;;  %v2751_v28 = vpop.f32.mrf.mxu1 }
 0x3c7   : > { %v3064_v22 = vadd.f32 %v3012_v16, %v2788_v56 }
 0x3c8   : > { %v2186_v21 = vpop.f32.mrf.mxu3 }
 0x3c9   : > { %3097 = vst.msk [vmem:[%s4880_s30 + $0xb0] sm:$0xff] %vm3074_vm3, %v3064_v22  ;;  %v2236_v63 = vadd.f32 %v2186_v21, %v5227_v57  ;;  %v3015_v12 = vpop.f32.mrf.mxu2 }
 0x3cb   : > { %v2513_v46 = vadd.f32 %v2463_v3, %v2236_v63 }
 0x3cd   : > { %v2789_v2 = vadd.f32 %v2739_v51, %v2513_v46  ;;  %v2478_v38 = vpop.f32.mrf.mxu0  ;;  %v2754_v33 = vpop.f32.mrf.mxu1 }
 0x3cf   : > { %v3065_v18 = vadd.f32 %v3015_v12, %v2789_v2 }
 0x3d0   : > { %v2189_v5 = vpop.f32.mrf.mxu3 }
 0x3d1   : > { %3098 = vst.msk [vmem:[%s4880_s30 + $0xb8] sm:$0xff] %vm3074_vm3, %v3065_v18  ;;  %v2237_v9 = vadd.f32 %v2189_v5, %v5228_v14  ;;  %v3018_v32 = vpop.f32.mrf.mxu2 }
 0x3d3   : > { %v2514_v0 = vadd.f32 %v2466_v11, %v2237_v9 }
 0x3d5   : > { %v2790_v43 = vadd.f32 %v2742_v35, %v2514_v0  ;;  %v2481_v20 = vpop.f32.mrf.mxu0  ;;  %v2757_v26 = vpop.f32.mrf.mxu1 }
 0x3d7   : > { %v3066_v19 = vadd.f32 %v3018_v32, %v2790_v43 }
 0x3d8   : > { %v2192_v4 = vpop.f32.mrf.mxu3 }
 0x3d9   : > { %3099 = vst.msk [vmem:[%s4880_s30 + $0xc0] sm:$0xff] %vm3074_vm3, %v3066_v19  ;;  %v2238_v58 = vadd.f32 %v2192_v4, %v5229_v34  ;;  %v3021_v44 = vpop.f32.mrf.mxu2 }
 0x3db   : > { %v2515_v6 = vadd.f32 %v2469_v23, %v2238_v58 }
 0x3dd   : > { %v2791_v37 = vadd.f32 %v2745_v49, %v2515_v6  ;;  %v2484_v16 = vpop.f32.mrf.mxu0 }
 0x3df   : > { %v3067_v60 = vadd.f32 %v3021_v44, %v2791_v37 }
 0x3e0   : > { %v2195_v47 = vpop.f32.mrf.mxu3 }
 0x3e1   : > { %3100 = vst.msk [vmem:[%s4880_s30 + $0xc8] sm:$0xff] %vm3074_vm3, %v3067_v60  ;;  %v2239_v29 = vadd.f32 %v2195_v47, %v4806_v31  ;;  %v3024_v25 = vpop.f32.mrf.mxu2 }
 0x3e3   : > { %v2516_v61 = vadd.f32 %v2472_v50, %v2239_v29 }
 0x3e5   : > { %v2792_v40 = vadd.f32 %v2748_v13, %v2516_v61  ;;  %v2487_v12 = vpop.f32.mrf.mxu0 }
 0x3e7   : > { %v3068_v42 = vadd.f32 %v3024_v25, %v2792_v40 }
 0x3e8   : > { %v2198_v27 = vpop.f32.mrf.mxu3 }
 0x3e9   : > { %3101 = vst.msk [vmem:[%s4880_s30 + $0xd0] sm:$0xff] %vm3074_vm3, %v3068_v42  ;;  %v2240_v59 = vadd.f32 %v2198_v27, %v4817_v30  ;;  %v3027_v8 = vpop.f32.mrf.mxu2 }
 0x3eb   : > { %v2517_v45 = vadd.f32 %v2475_v36, %v2240_v59 }
 0x3ed   : > { %v2793_v55 = vadd.f32 %v2751_v28, %v2517_v45 }
 0x3ef   : > { %v3069_v10 = vadd.f32 %v3027_v8, %v2793_v55 }
 0x3f0   : > { %v2201_v31 = vpop.f32.mrf.mxu3 }
 0x3f1   : > { %3102 = vst.msk [vmem:[%s4880_s30 + $0xd8] sm:$0xff] %vm3074_vm3, %v3069_v10  ;;  %v2241_v54 = vadd.f32 %v2201_v31, %v4828_v24  ;;  %v3030_v39 = vpop.f32.mrf.mxu2  ;;  %v2760_v24 = vpop.f32.mrf.mxu1 }
 0x3f3   : > { %v2518_v41 = vadd.f32 %v2478_v38, %v2241_v54 }
 0x3f5   : > { %v2794_v3 = vadd.f32 %v2754_v33, %v2518_v41 }
 0x3f7   : > { %v3070_v51 = vadd.f32 %v3030_v39, %v2794_v3 }
 0x3f8   : > { %v2204_v30 = vpop.f32.mrf.mxu3 }
 0x3f9   : > { %3103 = vst.msk [vmem:[%s4880_s30 + $0xe0] sm:$0xff] %vm3074_vm3, %v3070_v51  ;;  %v2242_v48 = vadd.f32 %v2204_v30, %v4838_v1  ;;  %v3033_v15 = vpop.f32.mrf.mxu2  ;;  %v2763_v46 = vpop.f32.mrf.mxu1 }
 0x3fb   : > { %v2519_v53 = vadd.f32 %v2481_v20, %v2242_v48 }
 0x3fd   : > { %v2795_v52 = vadd.f32 %v2757_v26, %v2519_v53 }
 0x3ff   : > { %v3071_v62 = vadd.f32 %v3033_v15, %v2795_v52 }
 0x400   : > { %v2207_v11 = vpop.f32.mrf.mxu3 }
 0x401   : > { %3104 = vst.msk [vmem:[%s4880_s30 + $0xe8] sm:$0xff] %vm3074_vm3, %v3071_v62  ;;  %v2243_v56 = vadd.f32 %v2207_v11, %v4850_v7  ;;  %v3036_v35 = vpop.f32.mrf.mxu2 }
 0x403   : > { %v2520_v22 = vadd.f32 %v2484_v16, %v2243_v56 }
 0x405   : > { %v2796_v21 = vadd.f32 %v2760_v24, %v2520_v22 }
 0x407   : > { %v3072_v57 = vadd.f32 %v3036_v35, %v2796_v21 }
 0x408   : > { %v2210_v63 = vpop.f32.mrf.mxu3 }
 0x409   : > { %3105 = vst.msk [vmem:[%s4880_s30 + $0xf0] sm:$0xff] %vm3074_vm3, %v3072_v57  ;;  %v2244_v1 = vadd.f32 %v2210_v63, %v4858_v17  ;;  %v3039_v23 = vpop.f32.mrf.mxu2 }
 0x40b   : > { %v2521_v2 = vadd.f32 %v2487_v12, %v2244_v1 }
 0x40d   : > { %v2797_v18 = vadd.f32 %v2763_v46, %v2521_v2 }
 0x40f   : > { %v3073_v49 = vadd.f32 %v3039_v23, %v2797_v18 }
 0x411   : > { %3106 = vst.msk [vmem:[%s4880_s30 + $0xf8] sm:$0xff] %vm3074_vm3, %v3073_v49 }
 0x412 PF: > { %s15_s18 = sadd.s32 1, %s3533_s18  }
 0x413   : > { %p12_p4 = scmp.ge.s32.totalorder %s15_s18, 4  }
 0x415   :  { %14 = sbr.rel (!%p12_p4) target bundleno = 1 (0x1), region = 81 }

</bundles_post_ra>
